<compile_context>
chip_gen: v6e
topology: v6e:2x2x1
jax: 0.10.0
libtpu: 0.0.40
codegen_flags: <defaults>
</compile_context>

<pallas_src>
import functools

import jax
import jax.numpy as jnp
from jax import lax
from jax.experimental import pallas as pl
from jax.experimental.pallas import tpu as pltpu


_SQRT1_2 = 0.7071067811865476


def _erf(u):
    # Abramowitz & Stegun 7.1.26 polynomial, |error| < 1.5e-7.
    # Uses only abs/mul/add/exp/where, all of which lower cleanly in Mosaic.
    a1, a2, a3, a4, a5 = (0.254829592, -0.284496736, 1.421413741,
                          -1.453152027, 1.061405429)
    pc = 0.3275911
    au = jnp.abs(u)
    t = 1.0 / (1.0 + pc * au)
    poly = ((((a5 * t + a4) * t + a3) * t + a2) * t + a1) * t
    y = 1.0 - poly * jnp.exp(-au * au)
    return jnp.where(u >= 0.0, y, -y)


def _gelu_erf(u):
    # exact (erf-based) GELU, matching torch.nn.GELU() default
    return 0.5 * u * (1.0 + _erf(u * _SQRT1_2))


# ----------------------------------------------------------------------------
# Fused kernel: QKV proj + GQA causal attention + out proj + GELU + resid + LN
# ----------------------------------------------------------------------------
def _attention_layer_kernel(x_ref, wq_ref, bq_ref, wk_ref, bk_ref, wv_ref,
                            bv_ref, wo_ref, bo_ref, gamma_ref, beta_ref,
                            out_ref, *, num_heads, kv_heads, group_num,
                            emb_dim, eps):
    L = x_ref.shape[1]
    E = emb_dim
    G = group_num

    x = x_ref[0]                                                     # (L, D)

    # --- fused QKV projections: one MXU matmul each --------------------------
    q = jnp.dot(x, wq_ref[...], preferred_element_type=jnp.float32) + bq_ref[...]
    k = jnp.dot(x, wk_ref[...], preferred_element_type=jnp.float32) + bk_ref[...]
    v = jnp.dot(x, wv_ref[...], preferred_element_type=jnp.float32) + bv_ref[...]

    # causal additive mask, replicated for the G query heads packed along M
    # (torch: triu(ones, diagonal=1) * -1e9 added after scaling).
    row = lax.broadcasted_iota(jnp.int32, (L, L), 0)
    col = lax.broadcasted_iota(jnp.int32, (L, L), 1)
    neg = jnp.where(col > row, jnp.float32(-1e9), jnp.float32(0.0))  # (L, L)
    mask_pk = jnp.concatenate([neg] * G, axis=0)                     # (G*L, L)

    scale = jnp.float32(1.0 / (E ** 0.5))
    ctx_pieces = [None] * num_heads

    # --- grouped-query attention: one packed matmul pair per KV head ---------
    for j in range(kv_heads):
        kj = k[:, j * E:(j + 1) * E]                                 # (L, E)
        vj = v[:, j * E:(j + 1) * E]                                 # (L, E)
        # query heads sharing KV head j (matches the reference reshape/expand)
        heads = [g * kv_heads + j for g in range(G)]
        # stack those G query heads along the sublane/M dim -> (G*L, E)
        q_pk = jnp.concatenate([q[:, h * E:(h + 1) * E] for h in heads], axis=0)

        # scores: contract on the shared E axis directly (no kj transpose)
        s = lax.dot_general(q_pk, kj, (((1,), (1,)), ((), ())),
                            preferred_element_type=jnp.float32)      # (G*L, L)
        s = s * scale + mask_pk
        s = s - jnp.max(s, axis=-1, keepdims=True)                   # stable softmax
        p = jnp.exp(s)
        p = p * pl.reciprocal(jnp.sum(p, axis=-1, keepdims=True), approx=True)

        ctx_pk = jnp.dot(p, vj, preferred_element_type=jnp.float32)  # (G*L, E)
        for g, h in enumerate(heads):
            ctx_pieces[h] = ctx_pk[g * L:(g + 1) * L, :]             # (L, E)

    # single K = H*E output-projection matmul (head order matches wo rows)
    ctx = jnp.concatenate(ctx_pieces, axis=1)                        # (L, H*E)
    o = jnp.dot(ctx, wo_ref[...], preferred_element_type=jnp.float32) + bo_ref[...]
    o = _gelu_erf(o)                                                 # exact GELU

    # --- residual add + LayerNorm (biased variance, eps=1e-5 like torch) -----
    z = x + o
    mean = jnp.mean(z, axis=-1, keepdims=True)
    cent = z - mean
    var = jnp.mean(cent * cent, axis=-1, keepdims=True)
    zn = cent * lax.rsqrt(var + jnp.float32(eps))
    out_ref[0] = (zn * gamma_ref[...] + beta_ref[...]).astype(out_ref.dtype)


# ----------------------------------------------------------------------------
# Wrapper
# ----------------------------------------------------------------------------
def attention_layer_forward(x, params, *, num_heads, group_num, emb_dim,
                            single_buffer_weights=True):
    B, L, D = x.shape
    kv_heads = num_heads // group_num
    out_dim = params["wo"].shape[1]
    assert D == out_dim, "residual add requires output_dim == input_dim"

    def weight_spec(shape):
        # Block index never changes across the grid -> single-buffer the
        # weights/biases to halve their resident VMEM (no re-DMA anyway).
        if single_buffer_weights:
            return pl.BlockSpec(shape, lambda b: (0, 0),
                                pipeline_mode=pl.Buffered(1))
        return pl.BlockSpec(shape, lambda b: (0, 0))

    kernel = functools.partial(
        _attention_layer_kernel, num_heads=num_heads, kv_heads=kv_heads,
        group_num=group_num, emb_dim=emb_dim, eps=1e-5)

    return pl.pallas_call(
        kernel,
        out_shape=jax.ShapeDtypeStruct((B, L, out_dim), x.dtype),
        grid=(B,),
        in_specs=[
            pl.BlockSpec((1, L, D), lambda b: (b, 0, 0)),
            weight_spec(params["wq"].shape), weight_spec(params["bq"].shape),
            weight_spec(params["wk"].shape), weight_spec(params["bk"].shape),
            weight_spec(params["wv"].shape), weight_spec(params["bv"].shape),
            weight_spec(params["wo"].shape), weight_spec(params["bo"].shape),
            weight_spec(params["gamma"].shape), weight_spec(params["beta"].shape),
        ],
        out_specs=pl.BlockSpec((1, L, out_dim), lambda b: (b, 0, 0)),
        compiler_params=pltpu.CompilerParams(
            dimension_semantics=("parallel",)),  # B>=2 -> both v7x TCs busy
    )(x, params["wq"], params["bq"], params["wk"], params["bk"],
      params["wv"], params["bv"], params["wo"], params["bo"],
      params["gamma"], params["beta"])


# ----------------------------------------------------------------------------
# Pure-JAX reference (mirrors the PyTorch forward) for a sanity check
# ----------------------------------------------------------------------------
def reference_forward(x, params, *, num_heads, group_num, emb_dim):
    B, L, D = x.shape
    kv_heads = num_heads // group_num
    q = x @ params["wq"] + params["bq"][0]
    k = x @ params["wk"] + params["bk"][0]
    v = x @ params["wv"] + params["bv"][0]
    q = q.reshape(B, L, num_heads, emb_dim).transpose(0, 2, 1, 3)
    k = jnp.tile(k.reshape(B, L, 1, kv_heads, emb_dim), (1, 1, group_num, 1, 1)) \
          .reshape(B, L, num_heads, emb_dim).transpose(0, 2, 1, 3)
    v = jnp.tile(v.reshape(B, L, 1, kv_heads, emb_dim), (1, 1, group_num, 1, 1)) \
          .reshape(B, L, num_heads, emb_dim).transpose(0, 2, 1, 3)
    s = jnp.einsum("bnle,bnfe->bnlf", q, k) / (emb_dim ** 0.5)
    mask = jnp.triu(jnp.ones((L, L), jnp.float32), k=1)
    s = s + mask * -1e9
    p = jax.nn.softmax(s, axis=-1)
    ctx = jnp.einsum("bnlf,bnfe->bnle", p, v).transpose(0, 2, 1, 3).reshape(B, L, -1)
    o = jax.nn.gelu(ctx @ params["wo"] + params["bo"][0], approximate=False)
    z = x + o
    mean = z.mean(-1, keepdims=True)
    var = ((z - mean) ** 2).mean(-1, keepdims=True)
    return (z - mean) / jnp.sqrt(var + 1e-5) * params["gamma"][0] + params["beta"][0]


# ----------------------------------------------------------------------------
# Main
# ----------------------------------------------------------------------------
if __name__ == "__main__":
    B, L = 2, 8
    input_dim = 32
    num_heads = 8
    group_num = 4
    emb_dim = 16
    output_dim = 32
    kv_heads = num_heads // group_num

    key = jax.random.PRNGKey(0)
    kx, kq, kk, kv, ko = jax.random.split(key, 5)

    def linear_init(k, fan_in, fan_out):
        kw, kb = jax.random.split(k)
        bound = 1.0 / (fan_in ** 0.5)
        w = jax.random.uniform(kw, (fan_in, fan_out), jnp.float32, -bound, bound)
        b = jax.random.uniform(kb, (1, fan_out), jnp.float32, -bound, bound)
        return w, b

    wq, bq = linear_init(kq, input_dim, emb_dim * num_heads)
    wk, bk = linear_init(kk, input_dim, emb_dim * kv_heads)
    wv, bv = linear_init(kv, input_dim, emb_dim * kv_heads)
    wo, bo = linear_init(ko, emb_dim * num_heads, output_dim)

    params = dict(
        wq=wq, bq=bq, wk=wk, bk=bk, wv=wv, bv=bv, wo=wo, bo=bo,
        gamma=jnp.ones((1, output_dim), jnp.float32),
        beta=jnp.zeros((1, output_dim), jnp.float32),
    )

    x = jax.random.normal(kx, (B, L, input_dim), jnp.float32)

    run = functools.partial(attention_layer_forward, x, params,
                            num_heads=num_heads, group_num=group_num,
                            emb_dim=emb_dim)
    try:
        out = jax.block_until_ready(run(single_buffer_weights=True))
    except Exception:
        # This Pallas build rejected pl.Buffered(1) -> fall back to default
        # double-buffering; everything else in the fused kernel is unchanged.
        out = jax.block_until_ready(run(single_buffer_weights=False))

    ref = jax.block_until_ready(
        reference_forward(x, params, num_heads=num_heads,
                          group_num=group_num, emb_dim=emb_dim))

    assert out.shape == (B, L, output_dim)
    assert bool(jnp.all(jnp.isfinite(out)))
    assert bool(jnp.allclose(out, ref, atol=2e-2, rtol=2e-2)), "mismatch vs reference"

    print("KERNEL_OK")
</pallas_src>

<mosaic_0001>
module attributes {stable_mosaic.version = 11 : i64} {
  func.func @_attention_layer_kernel(%arg0: i32, %arg1: memref<1x8x32xf32, #tpu.memory_space<vmem>>, %arg2: memref<32x128xf32, #tpu.memory_space<vmem>>, %arg3: memref<1x128xf32, #tpu.memory_space<vmem>>, %arg4: memref<32x32xf32, #tpu.memory_space<vmem>>, %arg5: memref<1x32xf32, #tpu.memory_space<vmem>>, %arg6: memref<32x32xf32, #tpu.memory_space<vmem>>, %arg7: memref<1x32xf32, #tpu.memory_space<vmem>>, %arg8: memref<128x32xf32, #tpu.memory_space<vmem>>, %arg9: memref<1x32xf32, #tpu.memory_space<vmem>>, %arg10: memref<1x32xf32, #tpu.memory_space<vmem>>, %arg11: memref<1x32xf32, #tpu.memory_space<vmem>>, %arg12: memref<1x8x32xf32, #tpu.memory_space<vmem>>) attributes {dimension_semantics = [#tpu.dimension_semantics<parallel>], iteration_bounds = array<i64: 2>, scalar_prefetch = 0 : i64, scratch_operands = 0 : i64, tpu.core_type = #tpu.core_type<tc>, window_params = [{transform_indices = @transform_0, window_bounds = array<i64: 1, 8, 32>}, {pipeline_mode = #tpu.pipeline_mode<synchronous>, transform_indices = @transform_1, window_bounds = array<i64: 32, 128>}, {pipeline_mode = #tpu.pipeline_mode<synchronous>, transform_indices = @transform_2, window_bounds = array<i64: 1, 128>}, {pipeline_mode = #tpu.pipeline_mode<synchronous>, transform_indices = @transform_3, window_bounds = array<i64: 32, 32>}, {pipeline_mode = #tpu.pipeline_mode<synchronous>, transform_indices = @transform_4, window_bounds = array<i64: 1, 32>}, {pipeline_mode = #tpu.pipeline_mode<synchronous>, transform_indices = @transform_5, window_bounds = array<i64: 32, 32>}, {pipeline_mode = #tpu.pipeline_mode<synchronous>, transform_indices = @transform_6, window_bounds = array<i64: 1, 32>}, {pipeline_mode = #tpu.pipeline_mode<synchronous>, transform_indices = @transform_7, window_bounds = array<i64: 128, 32>}, {pipeline_mode = #tpu.pipeline_mode<synchronous>, transform_indices = @transform_8, window_bounds = array<i64: 1, 32>}, {pipeline_mode = #tpu.pipeline_mode<synchronous>, transform_indices = @transform_9, window_bounds = array<i64: 1, 32>}, {pipeline_mode = #tpu.pipeline_mode<synchronous>, transform_indices = @transform_10, window_bounds = array<i64: 1, 32>}, {transform_indices = @transform_11, window_bounds = array<i64: 1, 8, 32>}]} {
    %c0 = arith.constant 0 : index
    %c0_0 = arith.constant 0 : index
    %c0_1 = arith.constant 0 : index
    %0 = vector.load %arg1[%c0, %c0_0, %c0_1] : memref<1x8x32xf32, #tpu.memory_space<vmem>>, vector<1x8x32xf32>
    %1 = vector.shape_cast %0 : vector<1x8x32xf32> to vector<8x32xf32>
    %c0_2 = arith.constant 0 : index
    %c0_3 = arith.constant 0 : index
    %2 = vector.load %arg2[%c0_2, %c0_3] : memref<32x128xf32, #tpu.memory_space<vmem>>, vector<32x128xf32>
    %cst = arith.constant dense<0.000000e+00> : vector<8x128xf32>
    %3 = tpu.matmul %1, %2, %cst {dimension_numbers = #tpu.dot_dimension_numbers<[1], [0], [0], [1], [0, 0, 1, 1], [], []>} : vector<8x32xf32>, vector<32x128xf32>, vector<8x128xf32> -> vector<8x128xf32>
    %c0_4 = arith.constant 0 : index
    %c0_5 = arith.constant 0 : index
    %4 = vector.load %arg3[%c0_4, %c0_5] : memref<1x128xf32, #tpu.memory_space<vmem>>, vector<1x128xf32>
    %5 = vector.broadcast %4 : vector<1x128xf32> to vector<8x128xf32>
    %6 = arith.addf %3, %5 : vector<8x128xf32>
    %c0_6 = arith.constant 0 : index
    %c0_7 = arith.constant 0 : index
    %7 = vector.load %arg4[%c0_6, %c0_7] : memref<32x32xf32, #tpu.memory_space<vmem>>, vector<32x32xf32>
    %cst_8 = arith.constant dense<0.000000e+00> : vector<8x32xf32>
    %8 = tpu.matmul %1, %7, %cst_8 {dimension_numbers = #tpu.dot_dimension_numbers<[1], [0], [0], [1], [0, 0, 1, 1], [], []>} : vector<8x32xf32>, vector<32x32xf32>, vector<8x32xf32> -> vector<8x32xf32>
    %c0_9 = arith.constant 0 : index
    %c0_10 = arith.constant 0 : index
    %9 = vector.load %arg5[%c0_9, %c0_10] : memref<1x32xf32, #tpu.memory_space<vmem>>, vector<1x32xf32>
    %10 = vector.broadcast %9 : vector<1x32xf32> to vector<8x32xf32>
    %11 = arith.addf %8, %10 : vector<8x32xf32>
    %c0_11 = arith.constant 0 : index
    %c0_12 = arith.constant 0 : index
    %12 = vector.load %arg6[%c0_11, %c0_12] : memref<32x32xf32, #tpu.memory_space<vmem>>, vector<32x32xf32>
    %cst_13 = arith.constant dense<0.000000e+00> : vector<8x32xf32>
    %13 = tpu.matmul %1, %12, %cst_13 {dimension_numbers = #tpu.dot_dimension_numbers<[1], [0], [0], [1], [0, 0, 1, 1], [], []>} : vector<8x32xf32>, vector<32x32xf32>, vector<8x32xf32> -> vector<8x32xf32>
    %c0_14 = arith.constant 0 : index
    %c0_15 = arith.constant 0 : index
    %14 = vector.load %arg7[%c0_14, %c0_15] : memref<1x32xf32, #tpu.memory_space<vmem>>, vector<1x32xf32>
    %15 = vector.broadcast %14 : vector<1x32xf32> to vector<8x32xf32>
    %16 = arith.addf %13, %15 : vector<8x32xf32>
    %17 = tpu.iota {dimensions = array<i32: 0>} : vector<8x8xi32>
    %18 = tpu.iota {dimensions = array<i32: 1>} : vector<8x8xi32>
    %19 = arith.cmpi sgt, %18, %17 : vector<8x8xi32>
    %cst_16 = arith.constant -1.000000e+09 : f32
    %cst_17 = arith.constant 0.000000e+00 : f32
    %20 = vector.broadcast %cst_16 : f32 to vector<8x8xf32>
    %21 = vector.broadcast %cst_17 : f32 to vector<8x8xf32>
    %22 = arith.select %19, %20, %21 : vector<8x8xi1>, vector<8x8xf32>
    %23 = tpu.concatenate %22, %22, %22, %22 in 0 : vector<8x8xf32>, vector<8x8xf32>, vector<8x8xf32>, vector<8x8xf32> -> vector<32x8xf32>
    %24 = vector.extract_strided_slice %11 {offsets = [0, 0], sizes = [8, 16], strides = [1, 1]} : vector<8x32xf32> to vector<8x16xf32>
    %25 = vector.extract_strided_slice %16 {offsets = [0, 0], sizes = [8, 16], strides = [1, 1]} : vector<8x32xf32> to vector<8x16xf32>
    %26 = vector.extract_strided_slice %6 {offsets = [0, 0], sizes = [8, 16], strides = [1, 1]} : vector<8x128xf32> to vector<8x16xf32>
    %27 = vector.extract_strided_slice %6 {offsets = [0, 32], sizes = [8, 16], strides = [1, 1]} : vector<8x128xf32> to vector<8x16xf32>
    %28 = vector.extract_strided_slice %6 {offsets = [0, 64], sizes = [8, 16], strides = [1, 1]} : vector<8x128xf32> to vector<8x16xf32>
    %29 = vector.extract_strided_slice %6 {offsets = [0, 96], sizes = [8, 16], strides = [1, 1]} : vector<8x128xf32> to vector<8x16xf32>
    %30 = tpu.concatenate %26, %27, %28, %29 in 0 : vector<8x16xf32>, vector<8x16xf32>, vector<8x16xf32>, vector<8x16xf32> -> vector<32x16xf32>
    %cst_18 = arith.constant dense<0.000000e+00> : vector<32x8xf32>
    %31 = tpu.matmul %30, %24, %cst_18 {dimension_numbers = #tpu.dot_dimension_numbers<[1], [1], [0], [0], [0, 0, 1, 0], [], []>} : vector<32x16xf32>, vector<8x16xf32>, vector<32x8xf32> -> vector<32x8xf32>
    %cst_19 = arith.constant 2.500000e-01 : f32
    %32 = vector.broadcast %cst_19 : f32 to vector<32x8xf32>
    %33 = arith.mulf %31, %32 : vector<32x8xf32>
    %34 = arith.addf %33, %23 : vector<32x8xf32>
    %cst_20 = arith.constant dense<0xFF800000> : vector<32xf32>
    %35 = vector.multi_reduction <maximumf>, %34, %cst_20 [1] : vector<32x8xf32> to vector<32xf32>
    %36 = vector.shape_cast %35 : vector<32xf32> to vector<32x1xf32>
    %37 = vector.broadcast %36 : vector<32x1xf32> to vector<32x8xf32>
    %38 = arith.subf %34, %37 : vector<32x8xf32>
    %39 = math.exp %38 : vector<32x8xf32>
    %cst_21 = arith.constant dense<0.000000e+00> : vector<32xf32>
    %40 = vector.multi_reduction <add>, %39, %cst_21 [1] : vector<32x8xf32> to vector<32xf32>
    %41 = vector.shape_cast %40 : vector<32xf32> to vector<32x1xf32>
    %42 = tpu.reciprocal %41 {approx = true} : vector<32x1xf32> -> vector<32x1xf32>
    %43 = vector.broadcast %42 : vector<32x1xf32> to vector<32x8xf32>
    %44 = arith.mulf %39, %43 : vector<32x8xf32>
    %cst_22 = arith.constant dense<0.000000e+00> : vector<32x16xf32>
    %45 = tpu.matmul %44, %25, %cst_22 {dimension_numbers = #tpu.dot_dimension_numbers<[1], [0], [0], [1], [0, 0, 1, 1], [], []>} : vector<32x8xf32>, vector<8x16xf32>, vector<32x16xf32> -> vector<32x16xf32>
    %46 = vector.extract_strided_slice %45 {offsets = [0, 0], sizes = [8, 16], strides = [1, 1]} : vector<32x16xf32> to vector<8x16xf32>
    %47 = vector.extract_strided_slice %45 {offsets = [8, 0], sizes = [8, 16], strides = [1, 1]} : vector<32x16xf32> to vector<8x16xf32>
    %48 = vector.extract_strided_slice %45 {offsets = [16, 0], sizes = [8, 16], strides = [1, 1]} : vector<32x16xf32> to vector<8x16xf32>
    %49 = vector.extract_strided_slice %45 {offsets = [24, 0], sizes = [8, 16], strides = [1, 1]} : vector<32x16xf32> to vector<8x16xf32>
    %50 = vector.extract_strided_slice %11 {offsets = [0, 16], sizes = [8, 16], strides = [1, 1]} : vector<8x32xf32> to vector<8x16xf32>
    %51 = vector.extract_strided_slice %16 {offsets = [0, 16], sizes = [8, 16], strides = [1, 1]} : vector<8x32xf32> to vector<8x16xf32>
    %52 = vector.extract_strided_slice %6 {offsets = [0, 16], sizes = [8, 16], strides = [1, 1]} : vector<8x128xf32> to vector<8x16xf32>
    %53 = vector.extract_strided_slice %6 {offsets = [0, 48], sizes = [8, 16], strides = [1, 1]} : vector<8x128xf32> to vector<8x16xf32>
    %54 = vector.extract_strided_slice %6 {offsets = [0, 80], sizes = [8, 16], strides = [1, 1]} : vector<8x128xf32> to vector<8x16xf32>
    %55 = vector.extract_strided_slice %6 {offsets = [0, 112], sizes = [8, 16], strides = [1, 1]} : vector<8x128xf32> to vector<8x16xf32>
    %56 = tpu.concatenate %52, %53, %54, %55 in 0 : vector<8x16xf32>, vector<8x16xf32>, vector<8x16xf32>, vector<8x16xf32> -> vector<32x16xf32>
    %cst_23 = arith.constant dense<0.000000e+00> : vector<32x8xf32>
    %57 = tpu.matmul %56, %50, %cst_23 {dimension_numbers = #tpu.dot_dimension_numbers<[1], [1], [0], [0], [0, 0, 1, 0], [], []>} : vector<32x16xf32>, vector<8x16xf32>, vector<32x8xf32> -> vector<32x8xf32>
    %cst_24 = arith.constant 2.500000e-01 : f32
    %58 = vector.broadcast %cst_24 : f32 to vector<32x8xf32>
    %59 = arith.mulf %57, %58 : vector<32x8xf32>
    %60 = arith.addf %59, %23 : vector<32x8xf32>
    %cst_25 = arith.constant dense<0xFF800000> : vector<32xf32>
    %61 = vector.multi_reduction <maximumf>, %60, %cst_25 [1] : vector<32x8xf32> to vector<32xf32>
    %62 = vector.shape_cast %61 : vector<32xf32> to vector<32x1xf32>
    %63 = vector.broadcast %62 : vector<32x1xf32> to vector<32x8xf32>
    %64 = arith.subf %60, %63 : vector<32x8xf32>
    %65 = math.exp %64 : vector<32x8xf32>
    %cst_26 = arith.constant dense<0.000000e+00> : vector<32xf32>
    %66 = vector.multi_reduction <add>, %65, %cst_26 [1] : vector<32x8xf32> to vector<32xf32>
    %67 = vector.shape_cast %66 : vector<32xf32> to vector<32x1xf32>
    %68 = tpu.reciprocal %67 {approx = true} : vector<32x1xf32> -> vector<32x1xf32>
    %69 = vector.broadcast %68 : vector<32x1xf32> to vector<32x8xf32>
    %70 = arith.mulf %65, %69 : vector<32x8xf32>
    %cst_27 = arith.constant dense<0.000000e+00> : vector<32x16xf32>
    %71 = tpu.matmul %70, %51, %cst_27 {dimension_numbers = #tpu.dot_dimension_numbers<[1], [0], [0], [1], [0, 0, 1, 1], [], []>} : vector<32x8xf32>, vector<8x16xf32>, vector<32x16xf32> -> vector<32x16xf32>
    %72 = vector.extract_strided_slice %71 {offsets = [0, 0], sizes = [8, 16], strides = [1, 1]} : vector<32x16xf32> to vector<8x16xf32>
    %73 = vector.extract_strided_slice %71 {offsets = [8, 0], sizes = [8, 16], strides = [1, 1]} : vector<32x16xf32> to vector<8x16xf32>
    %74 = vector.extract_strided_slice %71 {offsets = [16, 0], sizes = [8, 16], strides = [1, 1]} : vector<32x16xf32> to vector<8x16xf32>
    %75 = vector.extract_strided_slice %71 {offsets = [24, 0], sizes = [8, 16], strides = [1, 1]} : vector<32x16xf32> to vector<8x16xf32>
    %76 = tpu.concatenate %46, %72, %47, %73, %48, %74, %49, %75 in 1 : vector<8x16xf32>, vector<8x16xf32>, vector<8x16xf32>, vector<8x16xf32>, vector<8x16xf32>, vector<8x16xf32>, vector<8x16xf32>, vector<8x16xf32> -> vector<8x128xf32>
    %c0_28 = arith.constant 0 : index
    %c0_29 = arith.constant 0 : index
    %77 = vector.load %arg8[%c0_28, %c0_29] : memref<128x32xf32, #tpu.memory_space<vmem>>, vector<128x32xf32>
    %cst_30 = arith.constant dense<0.000000e+00> : vector<8x32xf32>
    %78 = tpu.matmul %76, %77, %cst_30 {dimension_numbers = #tpu.dot_dimension_numbers<[1], [0], [0], [1], [0, 0, 1, 1], [], []>} : vector<8x128xf32>, vector<128x32xf32>, vector<8x32xf32> -> vector<8x32xf32>
    %c0_31 = arith.constant 0 : index
    %c0_32 = arith.constant 0 : index
    %79 = vector.load %arg9[%c0_31, %c0_32] : memref<1x32xf32, #tpu.memory_space<vmem>>, vector<1x32xf32>
    %80 = vector.broadcast %79 : vector<1x32xf32> to vector<8x32xf32>
    %81 = arith.addf %78, %80 : vector<8x32xf32>
    %cst_33 = arith.constant 5.000000e-01 : f32
    %82 = vector.broadcast %cst_33 : f32 to vector<8x32xf32>
    %83 = arith.mulf %82, %81 : vector<8x32xf32>
    %cst_34 = arith.constant 0.707106769 : f32
    %84 = vector.broadcast %cst_34 : f32 to vector<8x32xf32>
    %85 = arith.mulf %81, %84 : vector<8x32xf32>
    %86 = math.absf %85 : vector<8x32xf32>
    %cst_35 = arith.constant 0.327591091 : f32
    %87 = vector.broadcast %cst_35 : f32 to vector<8x32xf32>
    %88 = arith.mulf %87, %86 : vector<8x32xf32>
    %cst_36 = arith.constant 1.000000e+00 : f32
    %89 = vector.broadcast %cst_36 : f32 to vector<8x32xf32>
    %90 = arith.addf %89, %88 : vector<8x32xf32>
    %cst_37 = arith.constant 1.000000e+00 : f32
    %91 = vector.broadcast %cst_37 : f32 to vector<8x32xf32>
    %92 = arith.divf %91, %90 : vector<8x32xf32>
    %cst_38 = arith.constant 1.06140542 : f32
    %93 = vector.broadcast %cst_38 : f32 to vector<8x32xf32>
    %94 = arith.mulf %93, %92 : vector<8x32xf32>
    %cst_39 = arith.constant -1.45315206 : f32
    %95 = vector.broadcast %cst_39 : f32 to vector<8x32xf32>
    %96 = arith.addf %94, %95 : vector<8x32xf32>
    %97 = arith.mulf %96, %92 : vector<8x32xf32>
    %cst_40 = arith.constant 1.42141378 : f32
    %98 = vector.broadcast %cst_40 : f32 to vector<8x32xf32>
    %99 = arith.addf %97, %98 : vector<8x32xf32>
    %100 = arith.mulf %99, %92 : vector<8x32xf32>
    %cst_41 = arith.constant -0.284496725 : f32
    %101 = vector.broadcast %cst_41 : f32 to vector<8x32xf32>
    %102 = arith.addf %100, %101 : vector<8x32xf32>
    %103 = arith.mulf %102, %92 : vector<8x32xf32>
    %cst_42 = arith.constant 0.254829586 : f32
    %104 = vector.broadcast %cst_42 : f32 to vector<8x32xf32>
    %105 = arith.addf %103, %104 : vector<8x32xf32>
    %106 = arith.mulf %105, %92 : vector<8x32xf32>
    %cst_43 = arith.constant 0.000000e+00 : f32
    %107 = vector.broadcast %cst_43 : f32 to vector<8x32xf32>
    %108 = arith.subf %107, %86 : vector<8x32xf32>
    %109 = arith.mulf %108, %86 : vector<8x32xf32>
    %110 = math.exp %109 : vector<8x32xf32>
    %111 = arith.mulf %106, %110 : vector<8x32xf32>
    %cst_44 = arith.constant 1.000000e+00 : f32
    %112 = vector.broadcast %cst_44 : f32 to vector<8x32xf32>
    %113 = arith.subf %112, %111 : vector<8x32xf32>
    %cst_45 = arith.constant 0.000000e+00 : f32
    %114 = vector.broadcast %cst_45 : f32 to vector<8x32xf32>
    %115 = arith.cmpf oge, %85, %114 : vector<8x32xf32>
    %cst_46 = arith.constant 0.000000e+00 : f32
    %116 = vector.broadcast %cst_46 : f32 to vector<8x32xf32>
    %117 = arith.subf %116, %113 : vector<8x32xf32>
    %118 = arith.select %115, %113, %117 : vector<8x32xi1>, vector<8x32xf32>
    %cst_47 = arith.constant 1.000000e+00 : f32
    %119 = vector.broadcast %cst_47 : f32 to vector<8x32xf32>
    %120 = arith.addf %119, %118 : vector<8x32xf32>
    %121 = arith.mulf %83, %120 : vector<8x32xf32>
    %122 = arith.addf %1, %121 : vector<8x32xf32>
    %cst_48 = arith.constant dense<0.000000e+00> : vector<8xf32>
    %123 = vector.multi_reduction <add>, %122, %cst_48 [1] : vector<8x32xf32> to vector<8xf32>
    %124 = vector.shape_cast %123 : vector<8xf32> to vector<8x1xf32>
    %cst_49 = arith.constant 3.200000e+01 : f32
    %125 = vector.broadcast %cst_49 : f32 to vector<8x1xf32>
    %126 = arith.divf %124, %125 : vector<8x1xf32>
    %127 = vector.broadcast %126 : vector<8x1xf32> to vector<8x32xf32>
    %128 = arith.subf %122, %127 : vector<8x32xf32>
    %129 = arith.mulf %128, %128 : vector<8x32xf32>
    %cst_50 = arith.constant dense<0.000000e+00> : vector<8xf32>
    %130 = vector.multi_reduction <add>, %129, %cst_50 [1] : vector<8x32xf32> to vector<8xf32>
    %131 = vector.shape_cast %130 : vector<8xf32> to vector<8x1xf32>
    %cst_51 = arith.constant 3.200000e+01 : f32
    %132 = vector.broadcast %cst_51 : f32 to vector<8x1xf32>
    %133 = arith.divf %131, %132 : vector<8x1xf32>
    %cst_52 = arith.constant 9.99999974E-6 : f32
    %134 = vector.broadcast %cst_52 : f32 to vector<8x1xf32>
    %135 = arith.addf %133, %134 : vector<8x1xf32>
    %136 = math.rsqrt %135 : vector<8x1xf32>
    %137 = vector.broadcast %136 : vector<8x1xf32> to vector<8x32xf32>
    %138 = arith.mulf %128, %137 : vector<8x32xf32>
    %c0_53 = arith.constant 0 : index
    %c0_54 = arith.constant 0 : index
    %139 = vector.load %arg10[%c0_53, %c0_54] : memref<1x32xf32, #tpu.memory_space<vmem>>, vector<1x32xf32>
    %140 = vector.broadcast %139 : vector<1x32xf32> to vector<8x32xf32>
    %141 = arith.mulf %138, %140 : vector<8x32xf32>
    %c0_55 = arith.constant 0 : index
    %c0_56 = arith.constant 0 : index
    %142 = vector.load %arg11[%c0_55, %c0_56] : memref<1x32xf32, #tpu.memory_space<vmem>>, vector<1x32xf32>
    %143 = vector.broadcast %142 : vector<1x32xf32> to vector<8x32xf32>
    %144 = arith.addf %141, %143 : vector<8x32xf32>
    %c0_57 = arith.constant 0 : index
    %c0_58 = arith.constant 0 : index
    %c0_59 = arith.constant 0 : index
    %145 = vector.load %arg12[%c0_57, %c0_58, %c0_59] : memref<1x8x32xf32, #tpu.memory_space<vmem>>, vector<1x8x32xf32>
    %146 = vector.shape_cast %145 : vector<1x8x32xf32> to vector<8x32xf32>
    %147 = vector.shape_cast %144 : vector<8x32xf32> to vector<1x8x32xf32>
    tpu.vector_store %arg12[%c0_57, %c0_58, %c0_59], %147 {strides = array<i32>} : memref<1x8x32xf32, #tpu.memory_space<vmem>>, vector<1x8x32xf32>,
    return
  }
  func.func @transform_0(%arg0: i32) -> (i32, i32, i32) {
    %c0_i32 = arith.constant 0 : i32
    %c0_i32_0 = arith.constant 0 : i32
    %c0_i32_1 = arith.constant 0 : i32
    return %arg0, %c0_i32, %c0_i32_0 : i32, i32, i32
  }
  func.func @transform_1(%arg0: i32) -> (i32, i32) {
    %c0_i32 = arith.constant 0 : i32
    %c0_i32_0 = arith.constant 0 : i32
    %c0_i32_1 = arith.constant 0 : i32
    return %c0_i32, %c0_i32_0 : i32, i32
  }
  func.func @transform_2(%arg0: i32) -> (i32, i32) {
    %c0_i32 = arith.constant 0 : i32
    %c0_i32_0 = arith.constant 0 : i32
    %c0_i32_1 = arith.constant 0 : i32
    return %c0_i32, %c0_i32_0 : i32, i32
  }
  func.func @transform_3(%arg0: i32) -> (i32, i32) {
    %c0_i32 = arith.constant 0 : i32
    %c0_i32_0 = arith.constant 0 : i32
    %c0_i32_1 = arith.constant 0 : i32
    return %c0_i32, %c0_i32_0 : i32, i32
  }
  func.func @transform_4(%arg0: i32) -> (i32, i32) {
    %c0_i32 = arith.constant 0 : i32
    %c0_i32_0 = arith.constant 0 : i32
    %c0_i32_1 = arith.constant 0 : i32
    return %c0_i32, %c0_i32_0 : i32, i32
  }
  func.func @transform_5(%arg0: i32) -> (i32, i32) {
    %c0_i32 = arith.constant 0 : i32
    %c0_i32_0 = arith.constant 0 : i32
    %c0_i32_1 = arith.constant 0 : i32
    return %c0_i32, %c0_i32_0 : i32, i32
  }
  func.func @transform_6(%arg0: i32) -> (i32, i32) {
    %c0_i32 = arith.constant 0 : i32
    %c0_i32_0 = arith.constant 0 : i32
    %c0_i32_1 = arith.constant 0 : i32
    return %c0_i32, %c0_i32_0 : i32, i32
  }
  func.func @transform_7(%arg0: i32) -> (i32, i32) {
    %c0_i32 = arith.constant 0 : i32
    %c0_i32_0 = arith.constant 0 : i32
    %c0_i32_1 = arith.constant 0 : i32
    return %c0_i32, %c0_i32_0 : i32, i32
  }
  func.func @transform_8(%arg0: i32) -> (i32, i32) {
    %c0_i32 = arith.constant 0 : i32
    %c0_i32_0 = arith.constant 0 : i32
    %c0_i32_1 = arith.constant 0 : i32
    return %c0_i32, %c0_i32_0 : i32, i32
  }
  func.func @transform_9(%arg0: i32) -> (i32, i32) {
    %c0_i32 = arith.constant 0 : i32
    %c0_i32_0 = arith.constant 0 : i32
    %c0_i32_1 = arith.constant 0 : i32
    return %c0_i32, %c0_i32_0 : i32, i32
  }
  func.func @transform_10(%arg0: i32) -> (i32, i32) {
    %c0_i32 = arith.constant 0 : i32
    %c0_i32_0 = arith.constant 0 : i32
    %c0_i32_1 = arith.constant 0 : i32
    return %c0_i32, %c0_i32_0 : i32, i32
  }
  func.func @transform_11(%arg0: i32) -> (i32, i32, i32) {
    %c0_i32 = arith.constant 0 : i32
    %c0_i32_0 = arith.constant 0 : i32
    %c0_i32_1 = arith.constant 0 : i32
    return %arg0, %c0_i32, %c0_i32_0 : i32, i32, i32
  }
}

module attributes {stable_mosaic.version = 11 : i64} {
  func.func @_attention_layer_kernel(%arg0: i32, %arg1: memref<1x8x32xf32, #tpu.memory_space<vmem>>, %arg2: memref<32x128xf32, #tpu.memory_space<vmem>>, %arg3: memref<1x128xf32, #tpu.memory_space<vmem>>, %arg4: memref<32x32xf32, #tpu.memory_space<vmem>>, %arg5: memref<1x32xf32, #tpu.memory_space<vmem>>, %arg6: memref<32x32xf32, #tpu.memory_space<vmem>>, %arg7: memref<1x32xf32, #tpu.memory_space<vmem>>, %arg8: memref<128x32xf32, #tpu.memory_space<vmem>>, %arg9: memref<1x32xf32, #tpu.memory_space<vmem>>, %arg10: memref<1x32xf32, #tpu.memory_space<vmem>>, %arg11: memref<1x32xf32, #tpu.memory_space<vmem>>, %arg12: memref<1x8x32xf32, #tpu.memory_space<vmem>>) attributes {dimension_semantics = [#tpu.dimension_semantics<parallel>], iteration_bounds = array<i64: 2>, scalar_prefetch = 0 : i64, scratch_operands = 0 : i64, tpu.core_type = #tpu.core_type<tc>, window_params = [{transform_indices = @transform_0, window_bounds = array<i64: 1, 8, 32>}, {pipeline_mode = #tpu.pipeline_mode<synchronous>, transform_indices = @transform_1, window_bounds = array<i64: 32, 128>}, {pipeline_mode = #tpu.pipeline_mode<synchronous>, transform_indices = @transform_2, window_bounds = array<i64: 1, 128>}, {pipeline_mode = #tpu.pipeline_mode<synchronous>, transform_indices = @transform_3, window_bounds = array<i64: 32, 32>}, {pipeline_mode = #tpu.pipeline_mode<synchronous>, transform_indices = @transform_4, window_bounds = array<i64: 1, 32>}, {pipeline_mode = #tpu.pipeline_mode<synchronous>, transform_indices = @transform_5, window_bounds = array<i64: 32, 32>}, {pipeline_mode = #tpu.pipeline_mode<synchronous>, transform_indices = @transform_6, window_bounds = array<i64: 1, 32>}, {pipeline_mode = #tpu.pipeline_mode<synchronous>, transform_indices = @transform_7, window_bounds = array<i64: 128, 32>}, {pipeline_mode = #tpu.pipeline_mode<synchronous>, transform_indices = @transform_8, window_bounds = array<i64: 1, 32>}, {pipeline_mode = #tpu.pipeline_mode<synchronous>, transform_indices = @transform_9, window_bounds = array<i64: 1, 32>}, {pipeline_mode = #tpu.pipeline_mode<synchronous>, transform_indices = @transform_10, window_bounds = array<i64: 1, 32>}, {transform_indices = @transform_11, window_bounds = array<i64: 1, 8, 32>}]} {
    %c0 = arith.constant 0 : index
    %c0_0 = arith.constant 0 : index
    %c0_1 = arith.constant 0 : index
    %0 = vector.load %arg1[%c0, %c0_0, %c0_1] : memref<1x8x32xf32, #tpu.memory_space<vmem>>, vector<1x8x32xf32>
    %1 = vector.shape_cast %0 : vector<1x8x32xf32> to vector<8x32xf32>
    %c0_2 = arith.constant 0 : index
    %c0_3 = arith.constant 0 : index
    %2 = vector.load %arg2[%c0_2, %c0_3] : memref<32x128xf32, #tpu.memory_space<vmem>>, vector<32x128xf32>
    %cst = arith.constant dense<0.000000e+00> : vector<8x128xf32>
    %3 = tpu.matmul %1, %2, %cst {dimension_numbers = #tpu.dot_dimension_numbers<[1], [0], [0], [1], [0, 0, 1, 1], [], []>} : vector<8x32xf32>, vector<32x128xf32>, vector<8x128xf32> -> vector<8x128xf32>
    %c0_4 = arith.constant 0 : index
    %c0_5 = arith.constant 0 : index
    %4 = vector.load %arg3[%c0_4, %c0_5] : memref<1x128xf32, #tpu.memory_space<vmem>>, vector<1x128xf32>
    %5 = vector.broadcast %4 : vector<1x128xf32> to vector<8x128xf32>
    %6 = arith.addf %3, %5 : vector<8x128xf32>
    %c0_6 = arith.constant 0 : index
    %c0_7 = arith.constant 0 : index
    %7 = vector.load %arg4[%c0_6, %c0_7] : memref<32x32xf32, #tpu.memory_space<vmem>>, vector<32x32xf32>
    %cst_8 = arith.constant dense<0.000000e+00> : vector<8x32xf32>
    %8 = tpu.matmul %1, %7, %cst_8 {dimension_numbers = #tpu.dot_dimension_numbers<[1], [0], [0], [1], [0, 0, 1, 1], [], []>} : vector<8x32xf32>, vector<32x32xf32>, vector<8x32xf32> -> vector<8x32xf32>
    %c0_9 = arith.constant 0 : index
    %c0_10 = arith.constant 0 : index
    %9 = vector.load %arg5[%c0_9, %c0_10] : memref<1x32xf32, #tpu.memory_space<vmem>>, vector<1x32xf32>
    %10 = vector.broadcast %9 : vector<1x32xf32> to vector<8x32xf32>
    %11 = arith.addf %8, %10 : vector<8x32xf32>
    %c0_11 = arith.constant 0 : index
    %c0_12 = arith.constant 0 : index
    %12 = vector.load %arg6[%c0_11, %c0_12] : memref<32x32xf32, #tpu.memory_space<vmem>>, vector<32x32xf32>
    %cst_13 = arith.constant dense<0.000000e+00> : vector<8x32xf32>
    %13 = tpu.matmul %1, %12, %cst_13 {dimension_numbers = #tpu.dot_dimension_numbers<[1], [0], [0], [1], [0, 0, 1, 1], [], []>} : vector<8x32xf32>, vector<32x32xf32>, vector<8x32xf32> -> vector<8x32xf32>
    %c0_14 = arith.constant 0 : index
    %c0_15 = arith.constant 0 : index
    %14 = vector.load %arg7[%c0_14, %c0_15] : memref<1x32xf32, #tpu.memory_space<vmem>>, vector<1x32xf32>
    %15 = vector.broadcast %14 : vector<1x32xf32> to vector<8x32xf32>
    %16 = arith.addf %13, %15 : vector<8x32xf32>
    %17 = tpu.iota {dimensions = array<i32: 0>} : vector<8x8xi32>
    %18 = tpu.iota {dimensions = array<i32: 1>} : vector<8x8xi32>
    %19 = arith.cmpi sgt, %18, %17 : vector<8x8xi32>
    %cst_16 = arith.constant -1.000000e+09 : f32
    %cst_17 = arith.constant 0.000000e+00 : f32
    %20 = vector.broadcast %cst_16 : f32 to vector<8x8xf32>
    %21 = vector.broadcast %cst_17 : f32 to vector<8x8xf32>
    %22 = arith.select %19, %20, %21 : vector<8x8xi1>, vector<8x8xf32>
    %23 = tpu.concatenate %22, %22, %22, %22 in 0 : vector<8x8xf32>, vector<8x8xf32>, vector<8x8xf32>, vector<8x8xf32> -> vector<32x8xf32>
    %24 = vector.extract_strided_slice %11 {offsets = [0, 0], sizes = [8, 16], strides = [1, 1]} : vector<8x32xf32> to vector<8x16xf32>
    %25 = vector.extract_strided_slice %16 {offsets = [0, 0], sizes = [8, 16], strides = [1, 1]} : vector<8x32xf32> to vector<8x16xf32>
    %26 = vector.extract_strided_slice %6 {offsets = [0, 0], sizes = [8, 16], strides = [1, 1]} : vector<8x128xf32> to vector<8x16xf32>
    %27 = vector.extract_strided_slice %6 {offsets = [0, 32], sizes = [8, 16], strides = [1, 1]} : vector<8x128xf32> to vector<8x16xf32>
    %28 = vector.extract_strided_slice %6 {offsets = [0, 64], sizes = [8, 16], strides = [1, 1]} : vector<8x128xf32> to vector<8x16xf32>
    %29 = vector.extract_strided_slice %6 {offsets = [0, 96], sizes = [8, 16], strides = [1, 1]} : vector<8x128xf32> to vector<8x16xf32>
    %30 = tpu.concatenate %26, %27, %28, %29 in 0 : vector<8x16xf32>, vector<8x16xf32>, vector<8x16xf32>, vector<8x16xf32> -> vector<32x16xf32>
    %cst_18 = arith.constant dense<0.000000e+00> : vector<32x8xf32>
    %31 = tpu.matmul %30, %24, %cst_18 {dimension_numbers = #tpu.dot_dimension_numbers<[1], [1], [0], [0], [0, 0, 1, 0], [], []>} : vector<32x16xf32>, vector<8x16xf32>, vector<32x8xf32> -> vector<32x8xf32>
    %cst_19 = arith.constant 2.500000e-01 : f32
    %32 = vector.broadcast %cst_19 : f32 to vector<32x8xf32>
    %33 = arith.mulf %31, %32 : vector<32x8xf32>
    %34 = arith.addf %33, %23 : vector<32x8xf32>
    %cst_20 = arith.constant dense<0xFF800000> : vector<32xf32>
    %35 = vector.multi_reduction <maximumf>, %34, %cst_20 [1] : vector<32x8xf32> to vector<32xf32>
    %36 = vector.shape_cast %35 : vector<32xf32> to vector<32x1xf32>
    %37 = vector.broadcast %36 : vector<32x1xf32> to vector<32x8xf32>
    %38 = arith.subf %34, %37 : vector<32x8xf32>
    %39 = math.exp %38 : vector<32x8xf32>
    %cst_21 = arith.constant dense<0.000000e+00> : vector<32xf32>
    %40 = vector.multi_reduction <add>, %39, %cst_21 [1] : vector<32x8xf32> to vector<32xf32>
    %41 = vector.shape_cast %40 : vector<32xf32> to vector<32x1xf32>
    %42 = tpu.reciprocal %41 {approx = true} : vector<32x1xf32> -> vector<32x1xf32>
    %43 = vector.broadcast %42 : vector<32x1xf32> to vector<32x8xf32>
    %44 = arith.mulf %39, %43 : vector<32x8xf32>
    %cst_22 = arith.constant dense<0.000000e+00> : vector<32x16xf32>
    %45 = tpu.matmul %44, %25, %cst_22 {dimension_numbers = #tpu.dot_dimension_numbers<[1], [0], [0], [1], [0, 0, 1, 1], [], []>} : vector<32x8xf32>, vector<8x16xf32>, vector<32x16xf32> -> vector<32x16xf32>
    %46 = vector.extract_strided_slice %45 {offsets = [0, 0], sizes = [8, 16], strides = [1, 1]} : vector<32x16xf32> to vector<8x16xf32>
    %47 = vector.extract_strided_slice %45 {offsets = [8, 0], sizes = [8, 16], strides = [1, 1]} : vector<32x16xf32> to vector<8x16xf32>
    %48 = vector.extract_strided_slice %45 {offsets = [16, 0], sizes = [8, 16], strides = [1, 1]} : vector<32x16xf32> to vector<8x16xf32>
    %49 = vector.extract_strided_slice %45 {offsets = [24, 0], sizes = [8, 16], strides = [1, 1]} : vector<32x16xf32> to vector<8x16xf32>
    %50 = vector.extract_strided_slice %11 {offsets = [0, 16], sizes = [8, 16], strides = [1, 1]} : vector<8x32xf32> to vector<8x16xf32>
    %51 = vector.extract_strided_slice %16 {offsets = [0, 16], sizes = [8, 16], strides = [1, 1]} : vector<8x32xf32> to vector<8x16xf32>
    %52 = vector.extract_strided_slice %6 {offsets = [0, 16], sizes = [8, 16], strides = [1, 1]} : vector<8x128xf32> to vector<8x16xf32>
    %53 = vector.extract_strided_slice %6 {offsets = [0, 48], sizes = [8, 16], strides = [1, 1]} : vector<8x128xf32> to vector<8x16xf32>
    %54 = vector.extract_strided_slice %6 {offsets = [0, 80], sizes = [8, 16], strides = [1, 1]} : vector<8x128xf32> to vector<8x16xf32>
    %55 = vector.extract_strided_slice %6 {offsets = [0, 112], sizes = [8, 16], strides = [1, 1]} : vector<8x128xf32> to vector<8x16xf32>
    %56 = tpu.concatenate %52, %53, %54, %55 in 0 : vector<8x16xf32>, vector<8x16xf32>, vector<8x16xf32>, vector<8x16xf32> -> vector<32x16xf32>
    %cst_23 = arith.constant dense<0.000000e+00> : vector<32x8xf32>
    %57 = tpu.matmul %56, %50, %cst_23 {dimension_numbers = #tpu.dot_dimension_numbers<[1], [1], [0], [0], [0, 0, 1, 0], [], []>} : vector<32x16xf32>, vector<8x16xf32>, vector<32x8xf32> -> vector<32x8xf32>
    %cst_24 = arith.constant 2.500000e-01 : f32
    %58 = vector.broadcast %cst_24 : f32 to vector<32x8xf32>
    %59 = arith.mulf %57, %58 : vector<32x8xf32>
    %60 = arith.addf %59, %23 : vector<32x8xf32>
    %cst_25 = arith.constant dense<0xFF800000> : vector<32xf32>
    %61 = vector.multi_reduction <maximumf>, %60, %cst_25 [1] : vector<32x8xf32> to vector<32xf32>
    %62 = vector.shape_cast %61 : vector<32xf32> to vector<32x1xf32>
    %63 = vector.broadcast %62 : vector<32x1xf32> to vector<32x8xf32>
    %64 = arith.subf %60, %63 : vector<32x8xf32>
    %65 = math.exp %64 : vector<32x8xf32>
    %cst_26 = arith.constant dense<0.000000e+00> : vector<32xf32>
    %66 = vector.multi_reduction <add>, %65, %cst_26 [1] : vector<32x8xf32> to vector<32xf32>
    %67 = vector.shape_cast %66 : vector<32xf32> to vector<32x1xf32>
    %68 = tpu.reciprocal %67 {approx = true} : vector<32x1xf32> -> vector<32x1xf32>
    %69 = vector.broadcast %68 : vector<32x1xf32> to vector<32x8xf32>
    %70 = arith.mulf %65, %69 : vector<32x8xf32>
    %cst_27 = arith.constant dense<0.000000e+00> : vector<32x16xf32>
    %71 = tpu.matmul %70, %51, %cst_27 {dimension_numbers = #tpu.dot_dimension_numbers<[1], [0], [0], [1], [0, 0, 1, 1], [], []>} : vector<32x8xf32>, vector<8x16xf32>, vector<32x16xf32> -> vector<32x16xf32>
    %72 = vector.extract_strided_slice %71 {offsets = [0, 0], sizes = [8, 16], strides = [1, 1]} : vector<32x16xf32> to vector<8x16xf32>
    %73 = vector.extract_strided_slice %71 {offsets = [8, 0], sizes = [8, 16], strides = [1, 1]} : vector<32x16xf32> to vector<8x16xf32>
    %74 = vector.extract_strided_slice %71 {offsets = [16, 0], sizes = [8, 16], strides = [1, 1]} : vector<32x16xf32> to vector<8x16xf32>
    %75 = vector.extract_strided_slice %71 {offsets = [24, 0], sizes = [8, 16], strides = [1, 1]} : vector<32x16xf32> to vector<8x16xf32>
    %76 = tpu.concatenate %46, %72, %47, %73, %48, %74, %49, %75 in 1 : vector<8x16xf32>, vector<8x16xf32>, vector<8x16xf32>, vector<8x16xf32>, vector<8x16xf32>, vector<8x16xf32>, vector<8x16xf32>, vector<8x16xf32> -> vector<8x128xf32>
    %c0_28 = arith.constant 0 : index
    %c0_29 = arith.constant 0 : index
    %77 = vector.load %arg8[%c0_28, %c0_29] : memref<128x32xf32, #tpu.memory_space<vmem>>, vector<128x32xf32>
    %cst_30 = arith.constant dense<0.000000e+00> : vector<8x32xf32>
    %78 = tpu.matmul %76, %77, %cst_30 {dimension_numbers = #tpu.dot_dimension_numbers<[1], [0], [0], [1], [0, 0, 1, 1], [], []>} : vector<8x128xf32>, vector<128x32xf32>, vector<8x32xf32> -> vector<8x32xf32>
    %c0_31 = arith.constant 0 : index
    %c0_32 = arith.constant 0 : index
    %79 = vector.load %arg9[%c0_31, %c0_32] : memref<1x32xf32, #tpu.memory_space<vmem>>, vector<1x32xf32>
    %80 = vector.broadcast %79 : vector<1x32xf32> to vector<8x32xf32>
    %81 = arith.addf %78, %80 : vector<8x32xf32>
    %cst_33 = arith.constant 5.000000e-01 : f32
    %82 = vector.broadcast %cst_33 : f32 to vector<8x32xf32>
    %83 = arith.mulf %82, %81 : vector<8x32xf32>
    %cst_34 = arith.constant 0.707106769 : f32
    %84 = vector.broadcast %cst_34 : f32 to vector<8x32xf32>
    %85 = arith.mulf %81, %84 : vector<8x32xf32>
    %86 = math.absf %85 : vector<8x32xf32>
    %cst_35 = arith.constant 0.327591091 : f32
    %87 = vector.broadcast %cst_35 : f32 to vector<8x32xf32>
    %88 = arith.mulf %87, %86 : vector<8x32xf32>
    %cst_36 = arith.constant 1.000000e+00 : f32
    %89 = vector.broadcast %cst_36 : f32 to vector<8x32xf32>
    %90 = arith.addf %89, %88 : vector<8x32xf32>
    %cst_37 = arith.constant 1.000000e+00 : f32
    %91 = vector.broadcast %cst_37 : f32 to vector<8x32xf32>
    %92 = arith.divf %91, %90 : vector<8x32xf32>
    %cst_38 = arith.constant 1.06140542 : f32
    %93 = vector.broadcast %cst_38 : f32 to vector<8x32xf32>
    %94 = arith.mulf %93, %92 : vector<8x32xf32>
    %cst_39 = arith.constant -1.45315206 : f32
    %95 = vector.broadcast %cst_39 : f32 to vector<8x32xf32>
    %96 = arith.addf %94, %95 : vector<8x32xf32>
    %97 = arith.mulf %96, %92 : vector<8x32xf32>
    %cst_40 = arith.constant 1.42141378 : f32
    %98 = vector.broadcast %cst_40 : f32 to vector<8x32xf32>
    %99 = arith.addf %97, %98 : vector<8x32xf32>
    %100 = arith.mulf %99, %92 : vector<8x32xf32>
    %cst_41 = arith.constant -0.284496725 : f32
    %101 = vector.broadcast %cst_41 : f32 to vector<8x32xf32>
    %102 = arith.addf %100, %101 : vector<8x32xf32>
    %103 = arith.mulf %102, %92 : vector<8x32xf32>
    %cst_42 = arith.constant 0.254829586 : f32
    %104 = vector.broadcast %cst_42 : f32 to vector<8x32xf32>
    %105 = arith.addf %103, %104 : vector<8x32xf32>
    %106 = arith.mulf %105, %92 : vector<8x32xf32>
    %cst_43 = arith.constant 0.000000e+00 : f32
    %107 = vector.broadcast %cst_43 : f32 to vector<8x32xf32>
    %108 = arith.subf %107, %86 : vector<8x32xf32>
    %109 = arith.mulf %108, %86 : vector<8x32xf32>
    %110 = math.exp %109 : vector<8x32xf32>
    %111 = arith.mulf %106, %110 : vector<8x32xf32>
    %cst_44 = arith.constant 1.000000e+00 : f32
    %112 = vector.broadcast %cst_44 : f32 to vector<8x32xf32>
    %113 = arith.subf %112, %111 : vector<8x32xf32>
    %cst_45 = arith.constant 0.000000e+00 : f32
    %114 = vector.broadcast %cst_45 : f32 to vector<8x32xf32>
    %115 = arith.cmpf oge, %85, %114 : vector<8x32xf32>
    %cst_46 = arith.constant 0.000000e+00 : f32
    %116 = vector.broadcast %cst_46 : f32 to vector<8x32xf32>
    %117 = arith.subf %116, %113 : vector<8x32xf32>
    %118 = arith.select %115, %113, %117 : vector<8x32xi1>, vector<8x32xf32>
    %cst_47 = arith.constant 1.000000e+00 : f32
    %119 = vector.broadcast %cst_47 : f32 to vector<8x32xf32>
    %120 = arith.addf %119, %118 : vector<8x32xf32>
    %121 = arith.mulf %83, %120 : vector<8x32xf32>
    %122 = arith.addf %1, %121 : vector<8x32xf32>
    %cst_48 = arith.constant dense<0.000000e+00> : vector<8xf32>
    %123 = vector.multi_reduction <add>, %122, %cst_48 [1] : vector<8x32xf32> to vector<8xf32>
    %124 = vector.shape_cast %123 : vector<8xf32> to vector<8x1xf32>
    %cst_49 = arith.constant 3.200000e+01 : f32
    %125 = vector.broadcast %cst_49 : f32 to vector<8x1xf32>
    %126 = arith.divf %124, %125 : vector<8x1xf32>
    %127 = vector.broadcast %126 : vector<8x1xf32> to vector<8x32xf32>
    %128 = arith.subf %122, %127 : vector<8x32xf32>
    %129 = arith.mulf %128, %128 : vector<8x32xf32>
    %cst_50 = arith.constant dense<0.000000e+00> : vector<8xf32>
    %130 = vector.multi_reduction <add>, %129, %cst_50 [1] : vector<8x32xf32> to vector<8xf32>
    %131 = vector.shape_cast %130 : vector<8xf32> to vector<8x1xf32>
    %cst_51 = arith.constant 3.200000e+01 : f32
    %132 = vector.broadcast %cst_51 : f32 to vector<8x1xf32>
    %133 = arith.divf %131, %132 : vector<8x1xf32>
    %cst_52 = arith.constant 9.99999974E-6 : f32
    %134 = vector.broadcast %cst_52 : f32 to vector<8x1xf32>
    %135 = arith.addf %133, %134 : vector<8x1xf32>
    %136 = math.rsqrt %135 : vector<8x1xf32>
    %137 = vector.broadcast %136 : vector<8x1xf32> to vector<8x32xf32>
    %138 = arith.mulf %128, %137 : vector<8x32xf32>
    %c0_53 = arith.constant 0 : index
    %c0_54 = arith.constant 0 : index
    %139 = vector.load %arg10[%c0_53, %c0_54] : memref<1x32xf32, #tpu.memory_space<vmem>>, vector<1x32xf32>
    %140 = vector.broadcast %139 : vector<1x32xf32> to vector<8x32xf32>
    %141 = arith.mulf %138, %140 : vector<8x32xf32>
    %c0_55 = arith.constant 0 : index
    %c0_56 = arith.constant 0 : index
    %142 = vector.load %arg11[%c0_55, %c0_56] : memref<1x32xf32, #tpu.memory_space<vmem>>, vector<1x32xf32>
    %143 = vector.broadcast %142 : vector<1x32xf32> to vector<8x32xf32>
    %144 = arith.addf %141, %143 : vector<8x32xf32>
    %c0_57 = arith.constant 0 : index
    %c0_58 = arith.constant 0 : index
    %c0_59 = arith.constant 0 : index
    %145 = vector.load %arg12[%c0_57, %c0_58, %c0_59] : memref<1x8x32xf32, #tpu.memory_space<vmem>>, vector<1x8x32xf32>
    %146 = vector.shape_cast %145 : vector<1x8x32xf32> to vector<8x32xf32>
    %147 = vector.shape_cast %144 : vector<8x32xf32> to vector<1x8x32xf32>
    tpu.vector_store %arg12[%c0_57, %c0_58, %c0_59], %147 {strides = array<i32>} : memref<1x8x32xf32, #tpu.memory_space<vmem>>, vector<1x8x32xf32>,
    return
  }
  func.func @transform_0(%arg0: i32) -> (i32, i32, i32) {
    %c0_i32 = arith.constant 0 : i32
    %c0_i32_0 = arith.constant 0 : i32
    %c0_i32_1 = arith.constant 0 : i32
    return %arg0, %c0_i32, %c0_i32_0 : i32, i32, i32
  }
  func.func @transform_1(%arg0: i32) -> (i32, i32) {
    %c0_i32 = arith.constant 0 : i32
    %c0_i32_0 = arith.constant 0 : i32
    %c0_i32_1 = arith.constant 0 : i32
    return %c0_i32, %c0_i32_0 : i32, i32
  }
  func.func @transform_2(%arg0: i32) -> (i32, i32) {
    %c0_i32 = arith.constant 0 : i32
    %c0_i32_0 = arith.constant 0 : i32
    %c0_i32_1 = arith.constant 0 : i32
    return %c0_i32, %c0_i32_0 : i32, i32
  }
  func.func @transform_3(%arg0: i32) -> (i32, i32) {
    %c0_i32 = arith.constant 0 : i32
    %c0_i32_0 = arith.constant 0 : i32
    %c0_i32_1 = arith.constant 0 : i32
    return %c0_i32, %c0_i32_0 : i32, i32
  }
  func.func @transform_4(%arg0: i32) -> (i32, i32) {
    %c0_i32 = arith.constant 0 : i32
    %c0_i32_0 = arith.constant 0 : i32
    %c0_i32_1 = arith.constant 0 : i32
    return %c0_i32, %c0_i32_0 : i32, i32
  }
  func.func @transform_5(%arg0: i32) -> (i32, i32) {
    %c0_i32 = arith.constant 0 : i32
    %c0_i32_0 = arith.constant 0 : i32
    %c0_i32_1 = arith.constant 0 : i32
    return %c0_i32, %c0_i32_0 : i32, i32
  }
  func.func @transform_6(%arg0: i32) -> (i32, i32) {
    %c0_i32 = arith.constant 0 : i32
    %c0_i32_0 = arith.constant 0 : i32
    %c0_i32_1 = arith.constant 0 : i32
    return %c0_i32, %c0_i32_0 : i32, i32
  }
  func.func @transform_7(%arg0: i32) -> (i32, i32) {
    %c0_i32 = arith.constant 0 : i32
    %c0_i32_0 = arith.constant 0 : i32
    %c0_i32_1 = arith.constant 0 : i32
    return %c0_i32, %c0_i32_0 : i32, i32
  }
  func.func @transform_8(%arg0: i32) -> (i32, i32) {
    %c0_i32 = arith.constant 0 : i32
    %c0_i32_0 = arith.constant 0 : i32
    %c0_i32_1 = arith.constant 0 : i32
    return %c0_i32, %c0_i32_0 : i32, i32
  }
  func.func @transform_9(%arg0: i32) -> (i32, i32) {
    %c0_i32 = arith.constant 0 : i32
    %c0_i32_0 = arith.constant 0 : i32
    %c0_i32_1 = arith.constant 0 : i32
    return %c0_i32, %c0_i32_0 : i32, i32
  }
  func.func @transform_10(%arg0: i32) -> (i32, i32) {
    %c0_i32 = arith.constant 0 : i32
    %c0_i32_0 = arith.constant 0 : i32
    %c0_i32_1 = arith.constant 0 : i32
    return %c0_i32, %c0_i32_0 : i32, i32
  }
  func.func @transform_11(%arg0: i32) -> (i32, i32, i32) {
    %c0_i32 = arith.constant 0 : i32
    %c0_i32_0 = arith.constant 0 : i32
    %c0_i32_1 = arith.constant 0 : i32
    return %arg0, %c0_i32, %c0_i32_0 : i32, i32, i32
  }
}

</mosaic_0001>

<bundles_post_ra>
// kernel: tpu_custom_call.1
= control target key start
LH: loop header
LB: loop body
LE: loop exit
PB: predicated region body
PF: predicated region fallthrough
CT: control target
= control target key end

     0   :  { %s2109_s0 = inlined_call_operand.vmem [shape: f32[2,8,32], index: 0, kind: input, shape index: {}]   ;;  %s2110_s1 = inlined_call_operand.vmem [shape: f32[32,128], index: 1, kind: input, shape index: {}]   ;;  %s2111_s2 = inlined_call_operand.vmem [shape: f32[1,128], index: 2, kind: input, shape index: {}]   ;;  %s2112_s3 = inlined_call_operand.vmem [shape: f32[32,32], index: 3, kind: input, shape index: {}]   ;;  %s2113_s4 = inlined_call_operand.vmem [shape: f32[1,32], index: 4, kind: input, shape index: {}]   ;;  %s2114_s5 = inlined_call_operand.vmem [shape: f32[32,32], index: 5, kind: input, shape index: {}]   ;;  %s2115_s6 = inlined_call_operand.vmem [shape: f32[1,32], index: 6, kind: input, shape index: {}]   ;;  %s2116_s7 = inlined_call_operand.vmem [shape: f32[128,32], index: 7, kind: input, shape index: {}]   ;;  %s2117_s8 = inlined_call_operand.vmem [shape: f32[1,32], index: 8, kind: input, shape index: {}]   ;;  %s2118_s9 = inlined_call_operand.vmem [shape: f32[1,32], index: 9, kind: input, shape index: {}]   ;;  %s2119_s10 = inlined_call_operand.vmem [shape: f32[1,32], index: 10, kind: input, shape index: {}]   ;;  %s2120_s11 = inlined_call_operand.hbm [shape: f32[2,8,32], index: 11, kind: output, shape index: {}]  }
   0x1   :  { %2123 = sst [smem:[#allocation5_spill]] %s2109_s0 }
   0x2   :  { %2124 = sst [smem:[#allocation6_spill]] %s2110_s1 }
   0x3   :  { %2125 = sst [smem:[#allocation7_spill]] %s2111_s2 }
   0x4   :  { %16 = vsyncpa [#allocation3], 0 }
   0x5   :  { %18 = vsyncpa [#allocation3 + $0x1], 0  ;;  %s1820_s17 = smov 0   ;;  %s1822_s18 = smov 0  }
   0x6   :  { %s1824_s19 = smov 0   ;;  %s1826_s20 = smov 0  }
   0x7 LB: > { %s1841_s21 = sadd.s32 4294967295, %s1748_s20   ;;  %s1413_s22 = sadd.s32 4294967294, %s1748_s20   ;;  %s1748_s20 = sphi %s1826_s20, %s2136_s20   ;;  %s1744_s19 = sphi %s1824_s19, %s2135_s19   ;;  %s1740_s18 = sphi %s1822_s18, %s2134_s18   ;;  %s1736_s17 = sphi %s1820_s17, %s2133_s17  }
   0x8   : > { %s1845_s23 = sadd.s32 1, %s1748_s20   ;;  %s267_s24 = sadd.s32 1, %s1744_s19 }
   0x9   : > { %s264_s25 = ssub.s32 %s1748_s20, %s1845_s23  ;;  %p277_p0 = scmp.ne.s32.totalorder %s1744_s19, %s1740_s18 }
   0xa   : > { %p265_p1 = scmp.eq.s32.totalorder %s264_s25, 0  ;;  %p278_p2 = scmp.eq.s32.totalorder %s1841_s21, 1 }
   0xb   : > { %p283_p3 = scmp.ne.s32.totalorder %s1740_s18, %s1736_s17  ;;  %p284_p4 = scmp.eq.s32.totalorder %s1413_s22, 1 }
   0xc   : > { %s1856_s26 = scalar_select %p265_p1, %s1744_s19, %s267_s24  }
   0xd   : > { %p1858_p5 = por %p278_p2, %p277_p0  ;;  %p1862_p6 = por %p284_p4, %p283_p3 }
   0xe   : > { %p1416_p7 = scmp.ge.s32.totalorder %s1748_s20, 1  ;;  %p339_p8 = scmp.lt.s32.totalorder %s1748_s20, 3 }
  0x10   : > { %p340_p9 = pnand %p1416_p7, %p339_p8 }
  0x11   : > { %s2128_s1 = sld [smem:[#allocation6_spill]] (!%p340_p9)  ;;  %p378_p10 = scmp.lt.s32.totalorder (!%p340_p9), %s1841_s21, 1 }
  0x12   : > { %343 = sbr.rel (%p340_p9) target bundleno = 1858 (0x742), region = 64  ;;  %s2129_s0 = sld [smem:[#allocation5_spill]] (!%p340_p9) }
  0x13   : > { %s2130_s2 = sld [smem:[#allocation7_spill]] (!%p340_p9)  ;;  %s1752_s13 = smov (!%p340_p9), 32  }
  0x14   : > { %s2121_s15 = smov (!%p340_p9), 96   ;;  %s1755_s24 = smov (!%p340_p9), 112  }
  0x15   : > { %s1756_s16 = smov (!%p340_p9), 48   ;;  %s1758_s25 = smov (!%p340_p9), 80  }
  0x16   : > { %s2132_s29 = smov (!%p340_p9), 96   ;;  %s375_s30 = sand.u32 (!%p340_p9), 1, %s1740_s18  }
  0x17   : > { %v386_v0 = vld [vmem:[%s2128_s1 + $0x18] sm:$0xff]  ;;  %v1750_v1 = vmov 0.0   ;;  %v385_v2 = vld [vmem:[%s2128_s1 + $0x10] sm:$0xff]  ;;  %vm1751_vm0 = vmmov 0   ;;  %s379_s14 = scalar_select %p378_p10, %s1841_s21, 1  ;;  %v384_v3 = vld [vmem:[%s2128_s1 + $0x8] sm:$0xff]  ;;  %v630_v30 = vlaneseq }
  0x18   : > { %1502 = vmatprep.subr.mxu0 %v1750_v1  ;;  %1510 = vmatprep.mubr.msk.f32.mxu0 %vm1751_vm0, %v1750_v1  ;;  %v383_v4 = vld [vmem:[%s2128_s1] sm:$0xff]  ;;  %vm394_vm1 = vcmask 261120   ;;  %v471_v6 = vld [vmem:[%s2112_s3 + $0x18] sm:$0xff]  ;;  %v470_v7 = vld [vmem:[%s2112_s3 + $0x10] sm:$0xff]  ;;  %vm643_vm2 = vcmask 130048   ;;  %vm748_vm4 = vcmask 64512  }
  0x19   : > { %1503 = vmatpush3.msra.mxu0 %v386_v0  ;;  %s1418_s22 = sshll.u32 %s379_s14, 3  ;;  %v469_v8 = vld [vmem:[%s2112_s3 + $0x8] sm:$0xff]  ;;  %v468_v9 = vld [vmem:[%s2112_s3] sm:$0xff]  ;;  %v552_v23 = vld [vmem:[%s2114_s5 + $0x18] sm:$0xff]  ;;  %v631_v31 = vshrl.u32 %v630_v30, 7  ;;  %v633_v32 = vand.u32 127, %v630_v30 }
  0x1a   : > { %1504 = vmatprep.subr.mxu0 %v1750_v1  ;;  %s381_s12 = scalar_lea.vmem %s2129_s0, %s1418_s22  ;;  %v1419_v10 = vld [vmem:[%s2130_s2] ss:$0 sm:$0xff]  ;;  %s2122_s22 = smov 64   ;;  %v551_v24 = vld [vmem:[%s2114_s5 + $0x10] sm:$0xff]  ;;  %v550_v25 = vld [vmem:[%s2114_s5 + $0x8] sm:$0xff]  ;;  %vm1178_vm5 = vcmask 392192  }
  0x1b   : > { %1505 = vmatpush3.msra.mxu0 %v385_v2  ;;  %v1890_v5 = vld [vmem:[%s381_s12] sm:$0xff]  ;;  %vm634_vm3 = vcmp.gt.s32.totalorder %v633_v32, %v631_v31  ;;  %vm1180_vm6 = vcmask 523264   ;;  %vm1182_vm7 = vcmask 654336   ;;  %vm1184_vm8 = vcmask 785408   ;;  %s1417_s12 = sshll.u32 %s375_s30, 3  ;;  %s1341_s2 = scalar_lea.sflag [#allocation3], %s375_s30 }
  0x1c   : > { %1506 = vmatprep.subr.mxu0 %v1750_v1  ;;  %v1421_v14 = vld [vmem:[%s2113_s4] ss:$0 sm:$0xff]  ;;  %v635_v34 = vsel %vm634_vm3, -1e+09, %v1750_v1  ;;  %vm1186_vm9 = vcmask 916480  }
  0x1d   : > { %1507 = vmatpush3.msra.mxu0 %v384_v3  ;;  %v549_v26 = vld [vmem:[%s2114_s5] sm:$0xff] }
  0x1e   : > { %1508 = vmatprep.subr.mxu0 %v1750_v1 }
  0x1f   : > { %1509 = vmatpush3.msra.mxu0 %v383_v4 }
  0x20   : > { %1511 = vmatmul.mubr.msk.f32.vlgmr.msra.gmra.mxu0 %vm394_vm1, %v1890_v5  ;;  %1513 = vmatprep.subr.mxu0 %v1750_v1 }
  0x21   : > { %1514 = vmatpush3.msra.mxu0 %v471_v6  ;;  %1521 = vmatprep.mubr.msk.f32.mxu0 %vm1751_vm0, %v1750_v1 }
  0x22   : > { %1515 = vmatprep.subr.mxu0 %v1750_v1 }
  0x23   : > { %1516 = vmatpush3.msra.mxu0 %v470_v7 }
  0x24   : > { %1517 = vmatprep.subr.mxu0 %v1750_v1 }
  0x25   : > { %1518 = vmatpush3.msra.mxu0 %v469_v8 }
  0x26   : > { %1519 = vmatprep.subr.mxu0 %v1750_v1 }
  0x27   : > { %1520 = vmatpush3.msra.mxu0 %v468_v9 }
  0x28   : > { %1522 = vmatmul.mubr.msk.f32.vlgmr.msra.gmra.mxu0 %vm394_vm1, %v1890_v5  ;;  %1524 = vmatprep.subr.mxu0 %v1750_v1 }
  0x29   : > { %1532 = vmatprep.mubr.msk.f32.mxu0 %vm1751_vm0, %v1750_v1  ;;  %1525 = vmatpush3.msra.mxu0 %v552_v23 }
  0x2a   : > { %1526 = vmatprep.subr.mxu0 %v1750_v1 }
  0x2b   : > { %1527 = vmatpush3.msra.mxu0 %v551_v24  ;;  %v1423_v24 = vld [vmem:[%s2115_s6] ss:$0 sm:$0xff] }
  0x2c   : > { %1528 = vmatprep.subr.mxu0 %v1750_v1 }
  0x2d   : > { %1529 = vmatpush3.msra.mxu0 %v550_v25 }
  0x2e   : > { %1530 = vmatprep.subr.mxu0 %v1750_v1 }
  0x2f   : > { %1531 = vmatpush3.msra.mxu0 %v549_v26 }
  0x30   : > { %1533 = vmatmul.mubr.msk.f32.vlgmr.msra.gmra.mxu0 %vm394_vm1, %v1890_v5 }
  0xe0   : > { %v464_v11 = vpop.f32.mrf.mxu0 }
  0xe1   : > { %v465_v12 = vadd.f32 %v1419_v10, %v464_v11 }
  0xe2   : > { %v1512_v13 = vpop.f32.mrf.mxu0 }
  0xe3   : > { %641 = vrot.lane.b32.xlu1 %v465_v12, %s1752_s13  ;;  %637 = vrot.lane.b32.xlu0 %v465_v12, %s2121_s15  ;;  %s1757_s15 = smov 16  }
  0xe4   : > { %1537 = vmatprep.mubr.msk.f32.mxu1 %vm643_vm2, %v465_v12 }
  0xe7   : > { %639 = vrot.lane.b32.xlu0 %v465_v12, %s2122_s22  ;;  %s2131_s22 = smov 64  }
  0xe8   : > { %v545_v15 = vpop.f32.mrf.mxu0 }
  0xe9   : > { %v546_v16 = vadd.f32 %v1421_v14, %v545_v15 }
  0xea   : > { %v1523_v17 = vpop.f32.mrf.mxu0 }
  0xeb   : > { %890 = vrot.lane.b32.xlu0 %v465_v12, %s1755_s24  ;;  %898 = vrot.lane.b32.xlu1 %v546_v16, %s1755_s24 }
  0xec   : > { %1535 = vmatprep.subr.msk.mxu1 %vm643_vm2, %v546_v16 }
  0xed   : > { %1536 = vmatpush3.xpose.msk.msra.mxu1 %vm643_vm2, %v546_v16 }
  0xf0   : > { %v626_v25 = vpop.f32.mrf.mxu0 }
  0xf1   : > { %v627_v26 = vadd.f32 %v1423_v24, %v626_v25  ;;  %v1191_v24 = vld [vmem:[%s2116_s7 + $0x18] sm:$0xff] }
  0xf3   : > { %1543 = vmatprep.subr.mxu0 %v627_v26 }
  0xf4   : > { %1544 = vmatpush3.msra.mxu0 %v627_v26 }
 0x155   : > { %v638_v18 = vpop.permute.xlu0 %637  ;;  %v642_v19 = vpop.permute.xlu1 %641 }
 0x156   : > { %892 = vrot.lane.b32.xlu1 %v638_v18, %s1755_s24  ;;  %1538 = vmatmul.mubr.msk.f32.vlgmr.msra.gmra.mxu1 %vm643_vm2, %v638_v18 }
 0x159   : > { %v640_v20 = vpop.permute.xlu0 %639 }
 0x15a   : > { %894 = vrot.lane.b32.xlu0 %v640_v20, %s1755_s24  ;;  %896 = vrot.lane.b32.xlu1 %v642_v19, %s1755_s24 }
 0x15b   : > { %1540 = vmatprep.mubr.msk.f32.mxu1 %vm643_vm2, %v640_v20 }
 0x15c   : > { %1541 = vmatmul.mubr.msk.f32.gmra.mxu1 %vm643_vm2, %v642_v19 }
 0x15d   : > { %v891_v21 = vpop.permute.xlu0 %890  ;;  %v899_v22 = vpop.permute.xlu1 %898 }
 0x15e   : > { %1553 = vmatprep.mubr.msk.f32.mxu1 %vm643_vm2, %v891_v21  ;;  %1551 = vmatprep.subr.msk.mxu1 %vm643_vm2, %v899_v22 }
 0x15f   : > { %1552 = vmatpush3.xpose.msk.msra.mxu1 %vm643_vm2, %v899_v22 }
 0x160   : > { %1567 = vmatprep.subr.mxu1 %v1750_v1 }
 0x1c8   : > { %v893_v27 = vpop.permute.xlu1 %892 }
 0x1c9   : > { %1554 = vmatmul.mubr.msk.f32.vlgmr.msra.gmra.mxu1 %vm643_vm2, %v893_v27  ;;  %v1534_v27 = vpop.f32.mrf.mxu0 }
 0x1ca   : > { %v1190_v27 = vld [vmem:[%s2116_s7 + $0x10] sm:$0xff] }
 0x1cc   : > { %v895_v28 = vpop.permute.xlu0 %894  ;;  %v897_v29 = vpop.permute.xlu1 %896 }
 0x1cd   : > { %1556 = vmatprep.mubr.msk.f32.mxu1 %vm643_vm2, %v895_v28 }
 0x1ce   : > { %1557 = vmatmul.mubr.msk.f32.gmra.mxu1 %vm643_vm2, %v897_v29 }
 0x1cf   : > { %1599 = vmatprep.mubr.msk.f32.mxu1 %vm1751_vm0, %v1750_v1 }
 0x216   : > { %v1539_v33 = vpop.f32.mrf.mxu1 }
 0x217   : > { %v741_v35 = vmul.f32 0.25, %v1539_v33 }
 0x218   : > { %v721_v36 = vpop.f32.mrf.mxu1 }
 0x219   : > { %v740_v37 = vmul.f32 0.25, %v721_v36  ;;  %v745_v38 = vadd.f32 %v741_v35, %v635_v34 }
 0x21b   : > { %v752_v39 = vsel %vm748_vm4, %v745_v38, -inf  ;;  %v744_v40 = vadd.f32 %v740_v37, %v635_v34 }
 0x21c   : > { %v1542_v41 = vpop.f32.mrf.mxu1  ;;  %753 = vmax.xlane.f32.xlu1 %v752_v39 }
 0x21d   : > { %v749_v42 = vsel %vm748_vm4, %v744_v40, -inf  ;;  %v743_v44 = vmul.f32 0.25, %v1542_v41 }
 0x21e   : > { %v731_v43 = vpop.f32.mrf.mxu1  ;;  %750 = vmax.xlane.f32.xlu0 %v749_v42 }
 0x21f   : > { %v742_v45 = vmul.f32 0.25, %v731_v43  ;;  %v747_v48 = vadd.f32 %v743_v44, %v635_v34 }
 0x221   : > { %v746_v46 = vadd.f32 %v742_v45, %v635_v34  ;;  %v758_v49 = vsel %vm748_vm4, %v747_v48, -inf }
 0x223   : > { %v755_v47 = vsel %vm748_vm4, %v746_v46, -inf }
 0x224   : > { %756 = vmax.xlane.f32.xlu0 %v755_v47 }
 0x228   : > { %759 = vmax.xlane.f32.xlu0 %v758_v49 }
 0x289   : > { %v1555_v50 = vpop.f32.mrf.mxu1 }
 0x28a   : > { %v996_v51 = vmul.f32 0.25, %v1555_v50 }
 0x28b   : > { %v976_v52 = vpop.f32.mrf.mxu1 }
 0x28c   : > { %v995_v53 = vmul.f32 0.25, %v976_v52  ;;  %v1000_v54 = vadd.f32 %v996_v51, %v635_v34 }
 0x28e   : > { %v1558_v55 = vpop.f32.mrf.mxu1  ;;  %v1006_v56 = vsel %vm748_vm4, %v1000_v54, -inf  ;;  %v999_v57 = vadd.f32 %v995_v53, %v635_v34 }
 0x28f   : > { %v998_v58 = vmul.f32 0.25, %v1558_v55  ;;  %1007 = vmax.xlane.f32.xlu0 %v1006_v56 }
 0x290   : > { %v986_v59 = vpop.f32.mrf.mxu1  ;;  %v1003_v60 = vsel %vm748_vm4, %v999_v57, -inf }
 0x291   : > { %v997_v61 = vmul.f32 0.25, %v986_v59  ;;  %1004 = vmax.xlane.f32.xlu1 %v1003_v60  ;;  %v1002_v62 = vadd.f32 %v998_v58, %v635_v34 }
 0x293   : > { %v1012_v63 = vsel %vm748_vm4, %v1002_v62, -inf  ;;  %v1001_v0 = vadd.f32 %v997_v61, %v635_v34 }
 0x294   : > { %1013 = vmax.xlane.f32.xlu0 %v1012_v63 }
 0x295   : > { %v1009_v2 = vsel %vm748_vm4, %v1001_v0, -inf }
 0x296   : > { %1010 = vmax.xlane.f32.xlu1 %v1009_v2 }
 0x2a5   : > { %v754_v3 = vpop.xlane.xlu1 %753 }
 0x2a6   : > { %v762_v4 = vsub.f32 %v745_v38, %v754_v3 }
 0x2a7   : > { %v751_v6 = vpop.xlane.xlu0 %750 }
 0x2a8   : > { %v767_v7 = vmul.f32 1.442695, %v762_v4  ;;  %v761_v8 = vsub.f32 %v744_v40, %v751_v6 }
 0x2aa   : > { %1650 = vpow2.f32 %v767_v7  ;;  %v765_v9 = vmul.f32 1.442695, %v761_v8 }
 0x2ac   : > { %1652 = vpow2.f32 %v765_v9 }
 0x2ad   : > { %v757_v10 = vpop.xlane.xlu0 %756 }
 0x2ae   : > { %v763_v11 = vsub.f32 %v746_v46, %v757_v10 }
 0x2b0   : > { %v769_v12 = vmul.f32 1.442695, %v763_v11  ;;  %v1203_v11 = vld [vmem:[%s2116_s7 + $0x78] sm:$0xff] }
 0x2b1   : > { %v760_v13 = vpop.xlane.xlu0 %759  ;;  %1568 = vmatpush3.msra.mxu1 %v1203_v11 }
 0x2b2   : > { %1654 = vpow2.f32 %v769_v12  ;;  %v764_v14 = vsub.f32 %v747_v48, %v760_v13  ;;  %v1202_v12 = vld [vmem:[%s2116_s7 + $0x70] sm:$0xff]  ;;  %1569 = vmatprep.subr.mxu1 %v1750_v1 }
 0x2b3   : > { %1570 = vmatpush3.msra.mxu1 %v1202_v12 }
 0x2b4   : > { %v771_v15 = vmul.f32 1.442695, %v764_v14  ;;  %v1201_v14 = vld [vmem:[%s2116_s7 + $0x68] sm:$0xff]  ;;  %1571 = vmatprep.subr.mxu1 %v1750_v1 }
 0x2b5   : > { %1572 = vmatpush3.msra.mxu1 %v1201_v14 }
 0x2b6   : > { %1656 = vpow2.f32 %v771_v15  ;;  %v1200_v15 = vld [vmem:[%s2116_s7 + $0x60] sm:$0xff]  ;;  %1573 = vmatprep.subr.mxu1 %v1750_v1 }
 0x2b7   : > { %v1651_v16 = vpop.eup %1650  ;;  %1574 = vmatpush3.msra.mxu1 %v1200_v15 }
 0x2b8   : > { %v776_v17 = vsel %vm748_vm4, %v1651_v16, 0.0  ;;  %1575 = vmatprep.subr.mxu1 %v1750_v1 }
 0x2b9   : > { %v1653_v18 = vpop.eup %1652  ;;  %777 = vadd.xlane.f32.xlu0 %v776_v17  ;;  %v1198_v17 = vld [vmem:[%s2116_s7 + $0x50] sm:$0xff] }
 0x2ba   : > { %v773_v19 = vsel %vm748_vm4, %v1653_v18, 0.0 }
 0x2bb   : > { %774 = vadd.xlane.f32.xlu1 %v773_v19  ;;  %v1196_v19 = vld [vmem:[%s2116_s7 + $0x40] sm:$0xff] }
 0x2bf   : > { %v1655_v20 = vpop.eup %1654 }
 0x2c0   : > { %v779_v21 = vsel %vm748_vm4, %v1655_v20, 0.0 }
 0x2c1   : > { %780 = vadd.xlane.f32.xlu1 %v779_v21  ;;  %v1194_v21 = vld [vmem:[%s2116_s7 + $0x30] sm:$0xff] }
 0x2c3   : > { %v1657_v22 = vpop.eup %1656 }
 0x2c4   : > { %v782_v23 = vsel %vm748_vm4, %v1657_v22, 0.0 }
 0x2c5   : > { %783 = vadd.xlane.f32.xlu0 %v782_v23  ;;  %v1192_v23 = vld [vmem:[%s2116_s7 + $0x20] sm:$0xff] }
 0x318   : > { %v1008_v28 = vpop.xlane.xlu0 %1007 }
 0x319   : > { %v1016_v29 = vsub.f32 %v1000_v54, %v1008_v28  ;;  %v1189_v28 = vld [vmem:[%s2116_s7 + $0x8] sm:$0xff] }
 0x31a   : > { %v1005_v30 = vpop.xlane.xlu1 %1004 }
 0x31b   : > { %v1021_v31 = vmul.f32 1.442695, %v1016_v29  ;;  %v1015_v32 = vsub.f32 %v999_v57, %v1005_v30  ;;  %v1188_v30 = vld [vmem:[%s2116_s7] sm:$0xff] }
 0x31d   : > { %1658 = vpow2.f32 %v1021_v31  ;;  %v1019_v33 = vmul.f32 1.442695, %v1015_v32  ;;  %v1014_v34 = vpop.xlane.xlu0 %1013 }
 0x31e   : > { %v1018_v35 = vsub.f32 %v1002_v62, %v1014_v34 }
 0x31f   : > { %1660 = vpow2.f32 %v1019_v33  ;;  %v1011_v36 = vpop.xlane.xlu1 %1010 }
 0x320   : > { %v1025_v37 = vmul.f32 1.442695, %v1018_v35  ;;  %v1017_v38 = vsub.f32 %v1001_v0, %v1011_v36 }
 0x322   : > { %1662 = vpow2.f32 %v1025_v37  ;;  %v1023_v39 = vmul.f32 1.442695, %v1017_v38 }
 0x324   : > { %1664 = vpow2.f32 %v1023_v39 }
 0x32a   : > { %v1659_v40 = vpop.eup %1658 }
 0x32b   : > { %v1030_v41 = vsel %vm748_vm4, %v1659_v40, 0.0 }
 0x32c   : > { %v1661_v42 = vpop.eup %1660  ;;  %1031 = vadd.xlane.f32.xlu0 %v1030_v41 }
 0x32d   : > { %v1027_v43 = vsel %vm748_vm4, %v1661_v42, 0.0 }
 0x32e   : > { %1028 = vadd.xlane.f32.xlu1 %v1027_v43 }
 0x32f   : > { %v1663_v44 = vpop.eup %1662 }
 0x330   : > { %v1036_v45 = vsel %vm748_vm4, %v1663_v44, 0.0 }
 0x331   : > { %v1665_v46 = vpop.eup %1664  ;;  %1037 = vadd.xlane.f32.xlu0 %v1036_v45 }
 0x332   : > { %v1033_v47 = vsel %vm748_vm4, %v1665_v46, 0.0 }
 0x333   : > { %1034 = vadd.xlane.f32.xlu1 %v1033_v47 }
 0x342   : > { %v778_v48 = vpop.xlane.xlu0 %777 }
 0x343   : > { %1666 = vrcp.f32 %v778_v48  ;;  %v1443_v48 = vld [vmem:[%s2117_s8] ss:$0 sm:$0xff] }
 0x344   : > { %v775_v49 = vpop.xlane.xlu1 %774  ;;  %1048 = vrot.lane.b32.xlu1 %v627_v26, %s1755_s24 }
 0x345   : > { %1668 = vrcp.f32 %v775_v49 }
 0x34a   : > { %v781_v50 = vpop.xlane.xlu1 %780 }
 0x34b   : > { %1670 = vrcp.f32 %v781_v50 }
 0x34e   : > { %v784_v51 = vpop.xlane.xlu0 %783 }
 0x34f   : > { %1672 = vrcp.f32 %v784_v51 }
 0x350   : > { %v1667_v52 = vpop.eup %1666 }
 0x351   : > { %v790_v55 = vmul.f32 %v1667_v52, %v1651_v16  ;;  %v1199_v16 = vld [vmem:[%s2116_s7 + $0x58] sm:$0xff] }
 0x352   : > { %v1669_v53 = vpop.eup %1668  ;;  %1576 = vmatpush3.msra.mxu1 %v1199_v16 }
 0x353   : > { %v789_v54 = vmul.f32 %v1669_v53, %v1653_v18  ;;  %1577 = vmatprep.subr.mxu1 %v1750_v1  ;;  %v1197_v18 = vld [vmem:[%s2116_s7 + $0x48] sm:$0xff] }
 0x354   : > { %1578 = vmatpush3.msra.mxu1 %v1198_v17 }
 0x355   : > { %1545 = vmatprep.mubr.msk.f32.mxu0 %vm748_vm4, %v789_v54  ;;  %1579 = vmatprep.subr.mxu1 %v1750_v1 }
 0x356   : > { %1546 = vmatmul.mubr.msk.f32.vlgmr.msra.gmra.mxu0 %vm748_vm4, %v790_v55  ;;  %1580 = vmatpush3.msra.mxu1 %v1197_v18 }
 0x357   : > { %1581 = vmatprep.subr.mxu1 %v1750_v1 }
 0x358   : > { %v1671_v56 = vpop.eup %1670  ;;  %1582 = vmatpush3.msra.mxu1 %v1196_v19 }
 0x359   : > { %v791_v57 = vmul.f32 %v1671_v56, %v1655_v20  ;;  %v1195_v20 = vld [vmem:[%s2116_s7 + $0x38] sm:$0xff]  ;;  %1583 = vmatprep.subr.mxu1 %v1750_v1 }
 0x35a   : > { %1584 = vmatpush3.msra.mxu1 %v1195_v20 }
 0x35b   : > { %1548 = vmatprep.mubr.msk.f32.mxu0 %vm748_vm4, %v791_v57  ;;  %1585 = vmatprep.subr.mxu1 %v1750_v1 }
 0x35c   : > { %v1673_v58 = vpop.eup %1672  ;;  %1586 = vmatpush3.msra.mxu1 %v1194_v21 }
 0x35d   : > { %v792_v59 = vmul.f32 %v1673_v58, %v1657_v22  ;;  %1587 = vmatprep.subr.mxu1 %v1750_v1  ;;  %v1193_v22 = vld [vmem:[%s2116_s7 + $0x28] sm:$0xff] }
 0x35e   : > { %1588 = vmatpush3.msra.mxu1 %v1193_v22 }
 0x35f   : > { %1549 = vmatmul.mubr.msk.f32.gmra.mxu0 %vm748_vm4, %v792_v59  ;;  %1589 = vmatprep.subr.mxu1 %v1750_v1 }
 0x360   : > { %1590 = vmatpush3.msra.mxu1 %v1192_v23 }
 0x361   : > { %1591 = vmatprep.subr.mxu1 %v1750_v1 }
 0x362   : > { %1592 = vmatpush3.msra.mxu1 %v1191_v24 }
 0x363   : > { %1593 = vmatprep.subr.mxu1 %v1750_v1 }
 0x364   : > { %1594 = vmatpush3.msra.mxu1 %v1190_v27  ;;  %v1445_v27 = vld [vmem:[%s2119_s10] ss:$0 sm:$0xff] }
 0x365   : > { %1595 = vmatprep.subr.mxu1 %v1750_v1 }
 0x366   : > { %1596 = vmatpush3.msra.mxu1 %v1189_v28 }
 0x367   : > { %1597 = vmatprep.subr.mxu1 %v1750_v1 }
 0x368   : > { %1598 = vmatpush3.msra.mxu1 %v1188_v30 }
 0x3b5   : > { %v1032_v60 = vpop.xlane.xlu0 %1031 }
 0x3b6   : > { %1674 = vrcp.f32 %v1032_v60 }
 0x3b7   : > { %v1029_v61 = vpop.xlane.xlu1 %1028 }
 0x3b8   : > { %1676 = vrcp.f32 %v1029_v61 }
 0x3ba   : > { %v1038_v62 = vpop.xlane.xlu0 %1037 }
 0x3bb   : > { %1678 = vrcp.f32 %v1038_v62 }
 0x3bc   : > { %v1035_v63 = vpop.xlane.xlu1 %1034 }
 0x3bd   : > { %1680 = vrcp.f32 %v1035_v63 }
 0x3c0   : > { %v1049_v0 = vpop.permute.xlu1 %1048 }
 0x3c1   : > { %1559 = vmatprep.subr.mxu0 %v1049_v0 }
 0x3c2   : > { %1560 = vmatpush3.msra.mxu0 %v1049_v0 }
 0x3c3   : > { %v1675_v2 = vpop.eup %1674 }
 0x3c4   : > { %v1044_v6 = vmul.f32 %v1675_v2, %v1659_v40 }
 0x3c5   : > { %v1677_v3 = vpop.eup %1676 }
 0x3c6   : > { %v1043_v4 = vmul.f32 %v1677_v3, %v1661_v42 }
 0x3c8   : > { %1561 = vmatprep.mubr.msk.f32.mxu0 %vm748_vm4, %v1043_v4  ;;  %v1679_v7 = vpop.eup %1678 }
 0x3c9   : > { %1562 = vmatmul.mubr.msk.f32.vlgmr.msra.gmra.mxu0 %vm748_vm4, %v1044_v6  ;;  %v1046_v10 = vmul.f32 %v1679_v7, %v1663_v44 }
 0x3ca   : > { %v1681_v8 = vpop.eup %1680 }
 0x3cb   : > { %v1045_v9 = vmul.f32 %v1681_v8, %v1665_v46 }
 0x3cd   : > { %1564 = vmatprep.mubr.msk.f32.mxu0 %vm748_vm4, %v1045_v9 }
 0x3ce   : > { %1565 = vmatmul.mubr.msk.f32.gmra.mxu0 %vm748_vm4, %v1046_v10 }
 0x416   : > { %v1547_v13 = vpop.f32.mrf.mxu0 }
 0x417   : > { %1153 = vrot.lane.b32.xlu1 %v1547_v13, %s1752_s13 }
 0x418   : > { %v871_v25 = vpop.f32.mrf.mxu0 }
 0x41f   : > { %v1550_v26 = vpop.f32.mrf.mxu0 }
 0x421   : > { %v881_v29 = vpop.f32.mrf.mxu0 }
 0x489   : > { %v1563_v31 = vpop.f32.mrf.mxu0  ;;  %v1154_v1 = vpop.permute.xlu1 %1153 }
 0x48a   : > { %1157 = vrot.lane.b32.xlu1 %v1563_v31, %s1756_s16  ;;  %s1759_s16 = smov [#allocation2]  }
 0x48b   : > { %v1129_v32 = vpop.f32.mrf.mxu0 }
 0x48c   : > { %1149 = vrot.lane.b32.xlu0 %v1129_v32, %s1757_s15  ;;  %s1692_s15 = sshll.u32 %s1759_s16, 4  ;;  %s1693_s15 = int_to_ptr.vmem [resolvable:$false] %s1692_s15 }
 0x48e   : > { %v1566_v33 = vpop.f32.mrf.mxu0 }
 0x490   : > { %1161 = vrot.lane.b32.xlu0 %v881_v29, %s2131_s22  ;;  %v1139_v34 = vpop.f32.mrf.mxu0 }
 0x491   : > { %1165 = vrot.lane.b32.xlu1 %v1139_v34, %s1758_s25  ;;  %s1447_s25 = sshll.u32 %s1841_s21, 7  ;;  %s1694_s21 = scalar_lea.vmem %s1693_s15, 256 }
 0x492   : > { %s1352_s1 = scalar_lea.hbm %s2120_s11, %s1447_s25 }
 0x494   : > { %1169 = vrot.lane.b32.xlu0 %v1550_v26, %s2132_s29  ;;  %s377_s29 = scalar_lea.vmem [#allocation2], %s1417_s12 }
 0x495   : > { %1173 = vrot.lane.b32.xlu1 %v1566_v33, %s1755_s24  ;;  %s1354_s24 = sshll.u32 %s377_s29, 4  ;;  %s1355_s24 = int_to_ptr.vmem [resolvable:$true] %s1354_s24 }
 0x496   : > { %s1688_s14 = scalar_lea.vmem %s1355_s24, 128  ;;  %p1695_p0 = scmp.lt.s32.totalorder %s1355_s24, %s1693_s15 }
 0x497   : > { %p1689_p11 = scmp.ne.s32.totalorder %s1355_s24, %s1688_s14  ;;  %p1696_p1 = scmp.lt.s32.totalorder %s1694_s21, %s1688_s14 }
 0x499   : > { %p1690_p12 = pnand %p1689_p11, %p1858_p5  ;;  %p1697_p2 = por %p1696_p1, %p1695_p0 }
 0x49b   : > { %p1691_p13 = pneg %p1690_p12 }
 0x49d   : > { %p1698_p3 = pnand %p1697_p2, %p1691_p13 }
 0x4fc   : > { %v1158_v36 = vpop.permute.xlu1 %1157 }
 0x4fe   : > { %v1150_v35 = vpop.permute.xlu0 %1149 }
 0x4ff   : > { %v1176_v37 = vsel %vm643_vm2, %v871_v25, %v1150_v35 }
 0x500   : > { %v1177_v38 = vsel %vm394_vm1, %v1176_v37, %v1154_v1 }
 0x501   : > { %v1179_v39 = vsel %vm1178_vm5, %v1177_v38, %v1158_v36 }
 0x502   : > { %v1162_v40 = vpop.permute.xlu0 %1161 }
 0x503   : > { %v1181_v41 = vsel %vm1180_vm6, %v1179_v39, %v1162_v40  ;;  %v1166_v42 = vpop.permute.xlu1 %1165 }
 0x504   : > { %v1183_v43 = vsel %vm1182_vm7, %v1181_v41, %v1166_v42 }
 0x506   : > { %v1170_v44 = vpop.permute.xlu0 %1169 }
 0x507   : > { %v1185_v45 = vsel %vm1184_vm8, %v1183_v43, %v1170_v44  ;;  %v1174_v46 = vpop.permute.xlu1 %1173 }
 0x508   : > { %v1187_v47 = vsel %vm1186_vm9, %v1185_v45, %v1174_v46 }
 0x509   : > { %1600 = vmatmul.mubr.f32.vlgmr.msra.gmra.mxu1 %v1187_v47 }
 0x5c9   : > { %v1277_v49 = vpop.f32.mrf.mxu1 }
 0x5ca   : > { %v1278_v50 = vadd.f32 %v1443_v48, %v1277_v49 }
 0x5cb   : > { %v1601_v51 = vpop.f32.mrf.mxu1 }
 0x5cc   : > { %v1282_v52 = vmul.f32 0.70710677, %v1278_v50  ;;  %v1281_v12 = vmul.f32 0.5, %v1278_v50 }
 0x5ce   : > { %v1283_v53 = vand.u32 2147483647, %v1282_v52  ;;  %vm1303_vm10 = vcmp.ge.f32.partialorder %v1282_v52, 0.0 }
 0x5d0   : > { %v1284_v54 = vmul.f32 0.3275911, %v1283_v53  ;;  %v1297_v56 = vsub.f32 0.0, %v1283_v53 }
 0x5d2   : > { %v1285_v55 = vadd.f32 1.0, %v1284_v54  ;;  %v1298_v57 = vmul.f32 %v1297_v56, %v1283_v53 }
 0x5d4   : > { %1682 = vrcp.f32 %v1285_v55  ;;  %v1299_v59 = vmul.f32 1.442695, %v1298_v57 }
 0x5d6   : > { %1684 = vpow2.f32 %v1299_v59 }
 0x5e1   : > { %v1683_v58 = vpop.eup %1682 }
 0x5e2   : > { %v1288_v60 = vmul.f32 1.0614054, %v1683_v58 }
 0x5e3   : > { %v1685_v7 = vpop.eup %1684 }
 0x5e4   : > { %v1289_v61 = vadd.f32 -1.4531521, %v1288_v60 }
 0x5e6   : > { %v1290_v62 = vmul.f32 %v1683_v58, %v1289_v61 }
 0x5e8   : > { %v1291_v63 = vadd.f32 1.4214138, %v1290_v62 }
 0x5ea   : > { %v1292_v0 = vmul.f32 %v1683_v58, %v1291_v63 }
 0x5ec   : > { %v1293_v2 = vadd.f32 -0.28449672, %v1292_v0 }
 0x5ee   : > { %v1294_v3 = vmul.f32 %v1683_v58, %v1293_v2 }
 0x5f0   : > { %v1295_v4 = vadd.f32 0.2548296, %v1294_v3 }
 0x5f2   : > { %v1296_v6 = vmul.f32 %v1683_v58, %v1295_v4 }
 0x5f4   : > { %v1301_v8 = vmul.f32 %v1685_v7, %v1296_v6 }
 0x5f6   : > { %v1302_v9 = vsub.f32 1.0, %v1301_v8 }
 0x5f8   : > { %v1304_v10 = vsub.f32 0.0, %v1302_v9 }
 0x5fa   : > { %v1305_v11 = vsel %vm1303_vm10, %v1302_v9, %v1304_v10 }
 0x5fb   : > { %v1306_v13 = vadd.f32 1.0, %v1305_v11 }
 0x5fd   : > { %v1307_v14 = vmul.f32 %v1306_v13, %v1281_v12 }
 0x5ff   : > { %v1308_v15 = vadd.f32 %v1307_v14, %v1890_v5  ;;  %v1444_v5 = vld [vmem:[%s2118_s9] ss:$0 sm:$0xff] }
 0x601   : > { %v1309_v16 = vsel %vm394_vm1, %v1308_v15, 0.0 }
 0x602   : > { %1310 = vadd.xlane.f32.xlu0 %v1309_v16 }
 0x68b   : > { %v1311_v17 = vpop.xlane.xlu0 %1310 }
 0x68c   : > { %v1313_v18 = vmul.f32 0.03125, %v1311_v17 }
 0x68e   : > { %v1314_v19 = vsub.f32 %v1308_v15, %v1313_v18 }
 0x690   : > { %v1315_v20 = vmul.f32 %v1314_v19, %v1314_v19 }
 0x692   : > { %v1316_v21 = vsel %vm394_vm1, %v1315_v20, 0.0 }
 0x693   : > { %1317 = vadd.xlane.f32.xlu1 %v1316_v21 }
 0x71c   : > { %v1318_v22 = vpop.xlane.xlu1 %1317 }
 0x71d   : > { %v1319_v23 = vmul.f32 0.03125, %v1318_v22 }
 0x71f   : > { %v1320_v24 = vadd.f32 1e-05, %v1319_v23 }
 0x721   : > { %1686 = vrsqrt.f32 %v1320_v24 }
 0x72e   : > { %v1687_v25 = vpop.eup %1686 }
 0x72f   : > { %v1322_v26 = vmul.f32 %v1687_v25, %v1314_v19 }
 0x731   : > { %v1330_v28 = vmul.f32 %v1444_v5, %v1322_v26 }
 0x733   : > { %v1338_v29 = vadd.f32 %v1445_v27, %v1330_v28 }
 0x735   : > { %1339 = vst.msk [vmem:[%s377_s29] sm:$0xff] %vm394_vm1, %v1338_v29 }
 0x736   : > { %1701 = shalt.err (!%p1698_p3)
}
 0x737   : > { %s1702_s0 = scalar_lea.hbm %s1352_s1, 128  ;;  %s1706_s22 = scalar_lea.hbm %s2120_s11, 256 }
 0x738   : > { %p1703_p4 = scmp.ne.s32.totalorder %s1352_s1, %s1702_s0  ;;  %p1707_p9 = scmp.lt.s32.totalorder %s1352_s1, %s2120_s11 }
 0x739   : > { %p1708_p10 = scmp.lt.s32.totalorder %s1706_s22, %s1702_s0 }
 0x73a   : > { %p1704_p7 = pnand %p1703_p4, %p1858_p5 }
 0x73b   : > { %p1709_p11 = por %p1708_p10, %p1707_p9 }
 0x73c   : > { %p1705_p8 = pneg %p1704_p7 }
 0x73e   : > { %p1710_p12 = pnand %p1709_p11, %p1705_p8 }
 0x740   : > { %1713 = shalt.err (!%p1710_p12)
}
 0x741   : > { %1602 = dma.vmem_to_hbm [thread:$0]  (%p1858_p5), %s1355_s24, 128, %s1352_s1, %s1341_s2  }
 0x742 PF: > { %p1608_p13 = scmp.ge.s32.totalorder %s1748_s20, 2  ;;  %s1366_s13 = sand.u32 1, %s1736_s17  }
 0x743   : > { %s1367_s14 = scalar_lea.sflag [#allocation3], %s1366_s13 }
 0x744   : > { %p1605_p0 = pnand %p1608_p13, %p1862_p6 }
 0x746   : > { %p1606_p1 = pneg %p1605_p0 }
 0x748   : > { %1731 = dma.done.wait (%p1606_p1), %s1367_s14, 128  }
 0x749   : > { %1733 = vsyncadd (%p1606_p1), %s1367_s14, 4294967168  ;;  %p21_p2 = scmp.ge.s32.totalorder %s1845_s23, 4   ;;  %s2133_s17 = smov %s1740_s18 }
 0x74a   : > { %s2134_s18 = smov %s1744_s19  ;;  %s2135_s19 = smov %s1856_s26 }
 0x74b   : > { %s2136_s20 = smov %s1845_s23  ;;  %23 = sbr.rel (!%p21_p2) target bundleno = 7 (0x7), region = 99 }
 0x750   :  { %1372 = vsyncpa [#allocation3], 1 }
 0x751   :  { %1374 = vsyncpa [#allocation3 + $0x1], 1 }

// kernel: tpu_custom_call.1
= control target key start
LH: loop header
LB: loop body
LE: loop exit
PB: predicated region body
PF: predicated region fallthrough
CT: control target
= control target key end

     0   :  { %s2109_s0 = inlined_call_operand.vmem [shape: f32[2,8,32], index: 0, kind: input, shape index: {}]   ;;  %s2110_s1 = inlined_call_operand.vmem [shape: f32[32,128], index: 1, kind: input, shape index: {}]   ;;  %s2111_s2 = inlined_call_operand.vmem [shape: f32[1,128], index: 2, kind: input, shape index: {}]   ;;  %s2112_s3 = inlined_call_operand.vmem [shape: f32[32,32], index: 3, kind: input, shape index: {}]   ;;  %s2113_s4 = inlined_call_operand.vmem [shape: f32[1,32], index: 4, kind: input, shape index: {}]   ;;  %s2114_s5 = inlined_call_operand.vmem [shape: f32[32,32], index: 5, kind: input, shape index: {}]   ;;  %s2115_s6 = inlined_call_operand.vmem [shape: f32[1,32], index: 6, kind: input, shape index: {}]   ;;  %s2116_s7 = inlined_call_operand.vmem [shape: f32[128,32], index: 7, kind: input, shape index: {}]   ;;  %s2117_s8 = inlined_call_operand.vmem [shape: f32[1,32], index: 8, kind: input, shape index: {}]   ;;  %s2118_s9 = inlined_call_operand.vmem [shape: f32[1,32], index: 9, kind: input, shape index: {}]   ;;  %s2119_s10 = inlined_call_operand.vmem [shape: f32[1,32], index: 10, kind: input, shape index: {}]   ;;  %s2120_s11 = inlined_call_operand.hbm [shape: f32[2,8,32], index: 11, kind: output, shape index: {}]  }
   0x1   :  { %2123 = sst [smem:[#allocation5_spill]] %s2109_s0 }
   0x2   :  { %2124 = sst [smem:[#allocation6_spill]] %s2110_s1 }
   0x3   :  { %2125 = sst [smem:[#allocation7_spill]] %s2111_s2 }
   0x4   :  { %16 = vsyncpa [#allocation3], 0 }
   0x5   :  { %18 = vsyncpa [#allocation3 + $0x1], 0  ;;  %s1820_s17 = smov 0   ;;  %s1822_s18 = smov 0  }
   0x6   :  { %s1824_s19 = smov 0   ;;  %s1826_s20 = smov 0  }
   0x7 LB: > { %s1841_s21 = sadd.s32 4294967295, %s1748_s20   ;;  %s1413_s22 = sadd.s32 4294967294, %s1748_s20   ;;  %s1748_s20 = sphi %s1826_s20, %s2136_s20   ;;  %s1744_s19 = sphi %s1824_s19, %s2135_s19   ;;  %s1740_s18 = sphi %s1822_s18, %s2134_s18   ;;  %s1736_s17 = sphi %s1820_s17, %s2133_s17  }
   0x8   : > { %s1845_s23 = sadd.s32 1, %s1748_s20   ;;  %s267_s24 = sadd.s32 1, %s1744_s19 }
   0x9   : > { %s264_s25 = ssub.s32 %s1748_s20, %s1845_s23  ;;  %p277_p0 = scmp.ne.s32.totalorder %s1744_s19, %s1740_s18 }
   0xa   : > { %p265_p1 = scmp.eq.s32.totalorder %s264_s25, 0  ;;  %p278_p2 = scmp.eq.s32.totalorder %s1841_s21, 1 }
   0xb   : > { %p283_p3 = scmp.ne.s32.totalorder %s1740_s18, %s1736_s17  ;;  %p284_p4 = scmp.eq.s32.totalorder %s1413_s22, 1 }
   0xc   : > { %s1856_s26 = scalar_select %p265_p1, %s1744_s19, %s267_s24  }
   0xd   : > { %p1858_p5 = por %p278_p2, %p277_p0  ;;  %p1862_p6 = por %p284_p4, %p283_p3 }
   0xe   : > { %p1416_p7 = scmp.ge.s32.totalorder %s1748_s20, 1  ;;  %p339_p8 = scmp.lt.s32.totalorder %s1748_s20, 3 }
  0x10   : > { %p340_p9 = pnand %p1416_p7, %p339_p8 }
  0x11   : > { %s2128_s1 = sld [smem:[#allocation6_spill]] (!%p340_p9)  ;;  %p378_p10 = scmp.lt.s32.totalorder (!%p340_p9), %s1841_s21, 1 }
  0x12   : > { %343 = sbr.rel (%p340_p9) target bundleno = 1858 (0x742), region = 64  ;;  %s2129_s0 = sld [smem:[#allocation5_spill]] (!%p340_p9) }
  0x13   : > { %s2130_s2 = sld [smem:[#allocation7_spill]] (!%p340_p9)  ;;  %s1752_s13 = smov (!%p340_p9), 32  }
  0x14   : > { %s2121_s15 = smov (!%p340_p9), 96   ;;  %s1755_s24 = smov (!%p340_p9), 112  }
  0x15   : > { %s1756_s16 = smov (!%p340_p9), 48   ;;  %s1758_s25 = smov (!%p340_p9), 80  }
  0x16   : > { %s2132_s29 = smov (!%p340_p9), 96   ;;  %s375_s30 = sand.u32 (!%p340_p9), 1, %s1740_s18  }
  0x17   : > { %v386_v0 = vld [vmem:[%s2128_s1 + $0x18] sm:$0xff]  ;;  %v1750_v1 = vmov 0.0   ;;  %v385_v2 = vld [vmem:[%s2128_s1 + $0x10] sm:$0xff]  ;;  %vm1751_vm0 = vmmov 0   ;;  %s379_s14 = scalar_select %p378_p10, %s1841_s21, 1  ;;  %v384_v3 = vld [vmem:[%s2128_s1 + $0x8] sm:$0xff]  ;;  %v630_v30 = vlaneseq }
  0x18   : > { %1502 = vmatprep.subr.mxu0 %v1750_v1  ;;  %1510 = vmatprep.mubr.msk.f32.mxu0 %vm1751_vm0, %v1750_v1  ;;  %v383_v4 = vld [vmem:[%s2128_s1] sm:$0xff]  ;;  %vm394_vm1 = vcmask 261120   ;;  %v471_v6 = vld [vmem:[%s2112_s3 + $0x18] sm:$0xff]  ;;  %v470_v7 = vld [vmem:[%s2112_s3 + $0x10] sm:$0xff]  ;;  %vm643_vm2 = vcmask 130048   ;;  %vm748_vm4 = vcmask 64512  }
  0x19   : > { %1503 = vmatpush3.msra.mxu0 %v386_v0  ;;  %s1418_s22 = sshll.u32 %s379_s14, 3  ;;  %v469_v8 = vld [vmem:[%s2112_s3 + $0x8] sm:$0xff]  ;;  %v468_v9 = vld [vmem:[%s2112_s3] sm:$0xff]  ;;  %v552_v23 = vld [vmem:[%s2114_s5 + $0x18] sm:$0xff]  ;;  %v631_v31 = vshrl.u32 %v630_v30, 7  ;;  %v633_v32 = vand.u32 127, %v630_v30 }
  0x1a   : > { %1504 = vmatprep.subr.mxu0 %v1750_v1  ;;  %s381_s12 = scalar_lea.vmem %s2129_s0, %s1418_s22  ;;  %v1419_v10 = vld [vmem:[%s2130_s2] ss:$0 sm:$0xff]  ;;  %s2122_s22 = smov 64   ;;  %v551_v24 = vld [vmem:[%s2114_s5 + $0x10] sm:$0xff]  ;;  %v550_v25 = vld [vmem:[%s2114_s5 + $0x8] sm:$0xff]  ;;  %vm1178_vm5 = vcmask 392192  }
  0x1b   : > { %1505 = vmatpush3.msra.mxu0 %v385_v2  ;;  %v1890_v5 = vld [vmem:[%s381_s12] sm:$0xff]  ;;  %vm634_vm3 = vcmp.gt.s32.totalorder %v633_v32, %v631_v31  ;;  %vm1180_vm6 = vcmask 523264   ;;  %vm1182_vm7 = vcmask 654336   ;;  %vm1184_vm8 = vcmask 785408   ;;  %s1417_s12 = sshll.u32 %s375_s30, 3  ;;  %s1341_s2 = scalar_lea.sflag [#allocation3], %s375_s30 }
  0x1c   : > { %1506 = vmatprep.subr.mxu0 %v1750_v1  ;;  %v1421_v14 = vld [vmem:[%s2113_s4] ss:$0 sm:$0xff]  ;;  %v635_v34 = vsel %vm634_vm3, -1e+09, %v1750_v1  ;;  %vm1186_vm9 = vcmask 916480  }
  0x1d   : > { %1507 = vmatpush3.msra.mxu0 %v384_v3  ;;  %v549_v26 = vld [vmem:[%s2114_s5] sm:$0xff] }
  0x1e   : > { %1508 = vmatprep.subr.mxu0 %v1750_v1 }
  0x1f   : > { %1509 = vmatpush3.msra.mxu0 %v383_v4 }
  0x20   : > { %1511 = vmatmul.mubr.msk.f32.vlgmr.msra.gmra.mxu0 %vm394_vm1, %v1890_v5  ;;  %1513 = vmatprep.subr.mxu0 %v1750_v1 }
  0x21   : > { %1514 = vmatpush3.msra.mxu0 %v471_v6  ;;  %1521 = vmatprep.mubr.msk.f32.mxu0 %vm1751_vm0, %v1750_v1 }
  0x22   : > { %1515 = vmatprep.subr.mxu0 %v1750_v1 }
  0x23   : > { %1516 = vmatpush3.msra.mxu0 %v470_v7 }
  0x24   : > { %1517 = vmatprep.subr.mxu0 %v1750_v1 }
  0x25   : > { %1518 = vmatpush3.msra.mxu0 %v469_v8 }
  0x26   : > { %1519 = vmatprep.subr.mxu0 %v1750_v1 }
  0x27   : > { %1520 = vmatpush3.msra.mxu0 %v468_v9 }
  0x28   : > { %1522 = vmatmul.mubr.msk.f32.vlgmr.msra.gmra.mxu0 %vm394_vm1, %v1890_v5  ;;  %1524 = vmatprep.subr.mxu0 %v1750_v1 }
  0x29   : > { %1532 = vmatprep.mubr.msk.f32.mxu0 %vm1751_vm0, %v1750_v1  ;;  %1525 = vmatpush3.msra.mxu0 %v552_v23 }
  0x2a   : > { %1526 = vmatprep.subr.mxu0 %v1750_v1 }
  0x2b   : > { %1527 = vmatpush3.msra.mxu0 %v551_v24  ;;  %v1423_v24 = vld [vmem:[%s2115_s6] ss:$0 sm:$0xff] }
  0x2c   : > { %1528 = vmatprep.subr.mxu0 %v1750_v1 }
  0x2d   : > { %1529 = vmatpush3.msra.mxu0 %v550_v25 }
  0x2e   : > { %1530 = vmatprep.subr.mxu0 %v1750_v1 }
  0x2f   : > { %1531 = vmatpush3.msra.mxu0 %v549_v26 }
  0x30   : > { %1533 = vmatmul.mubr.msk.f32.vlgmr.msra.gmra.mxu0 %vm394_vm1, %v1890_v5 }
  0xe0   : > { %v464_v11 = vpop.f32.mrf.mxu0 }
  0xe1   : > { %v465_v12 = vadd.f32 %v1419_v10, %v464_v11 }
  0xe2   : > { %v1512_v13 = vpop.f32.mrf.mxu0 }
  0xe3   : > { %641 = vrot.lane.b32.xlu1 %v465_v12, %s1752_s13  ;;  %637 = vrot.lane.b32.xlu0 %v465_v12, %s2121_s15  ;;  %s1757_s15 = smov 16  }
  0xe4   : > { %1537 = vmatprep.mubr.msk.f32.mxu1 %vm643_vm2, %v465_v12 }
  0xe7   : > { %639 = vrot.lane.b32.xlu0 %v465_v12, %s2122_s22  ;;  %s2131_s22 = smov 64  }
  0xe8   : > { %v545_v15 = vpop.f32.mrf.mxu0 }
  0xe9   : > { %v546_v16 = vadd.f32 %v1421_v14, %v545_v15 }
  0xea   : > { %v1523_v17 = vpop.f32.mrf.mxu0 }
  0xeb   : > { %890 = vrot.lane.b32.xlu0 %v465_v12, %s1755_s24  ;;  %898 = vrot.lane.b32.xlu1 %v546_v16, %s1755_s24 }
  0xec   : > { %1535 = vmatprep.subr.msk.mxu1 %vm643_vm2, %v546_v16 }
  0xed   : > { %1536 = vmatpush3.xpose.msk.msra.mxu1 %vm643_vm2, %v546_v16 }
  0xf0   : > { %v626_v25 = vpop.f32.mrf.mxu0 }
  0xf1   : > { %v627_v26 = vadd.f32 %v1423_v24, %v626_v25  ;;  %v1191_v24 = vld [vmem:[%s2116_s7 + $0x18] sm:$0xff] }
  0xf3   : > { %1543 = vmatprep.subr.mxu0 %v627_v26 }
  0xf4   : > { %1544 = vmatpush3.msra.mxu0 %v627_v26 }
 0x155   : > { %v638_v18 = vpop.permute.xlu0 %637  ;;  %v642_v19 = vpop.permute.xlu1 %641 }
 0x156   : > { %892 = vrot.lane.b32.xlu1 %v638_v18, %s1755_s24  ;;  %1538 = vmatmul.mubr.msk.f32.vlgmr.msra.gmra.mxu1 %vm643_vm2, %v638_v18 }
 0x159   : > { %v640_v20 = vpop.permute.xlu0 %639 }
 0x15a   : > { %894 = vrot.lane.b32.xlu0 %v640_v20, %s1755_s24  ;;  %896 = vrot.lane.b32.xlu1 %v642_v19, %s1755_s24 }
 0x15b   : > { %1540 = vmatprep.mubr.msk.f32.mxu1 %vm643_vm2, %v640_v20 }
 0x15c   : > { %1541 = vmatmul.mubr.msk.f32.gmra.mxu1 %vm643_vm2, %v642_v19 }
 0x15d   : > { %v891_v21 = vpop.permute.xlu0 %890  ;;  %v899_v22 = vpop.permute.xlu1 %898 }
 0x15e   : > { %1553 = vmatprep.mubr.msk.f32.mxu1 %vm643_vm2, %v891_v21  ;;  %1551 = vmatprep.subr.msk.mxu1 %vm643_vm2, %v899_v22 }
 0x15f   : > { %1552 = vmatpush3.xpose.msk.msra.mxu1 %vm643_vm2, %v899_v22 }
 0x160   : > { %1567 = vmatprep.subr.mxu1 %v1750_v1 }
 0x1c8   : > { %v893_v27 = vpop.permute.xlu1 %892 }
 0x1c9   : > { %1554 = vmatmul.mubr.msk.f32.vlgmr.msra.gmra.mxu1 %vm643_vm2, %v893_v27  ;;  %v1534_v27 = vpop.f32.mrf.mxu0 }
 0x1ca   : > { %v1190_v27 = vld [vmem:[%s2116_s7 + $0x10] sm:$0xff] }
 0x1cc   : > { %v895_v28 = vpop.permute.xlu0 %894  ;;  %v897_v29 = vpop.permute.xlu1 %896 }
 0x1cd   : > { %1556 = vmatprep.mubr.msk.f32.mxu1 %vm643_vm2, %v895_v28 }
 0x1ce   : > { %1557 = vmatmul.mubr.msk.f32.gmra.mxu1 %vm643_vm2, %v897_v29 }
 0x1cf   : > { %1599 = vmatprep.mubr.msk.f32.mxu1 %vm1751_vm0, %v1750_v1 }
 0x216   : > { %v1539_v33 = vpop.f32.mrf.mxu1 }
 0x217   : > { %v741_v35 = vmul.f32 0.25, %v1539_v33 }
 0x218   : > { %v721_v36 = vpop.f32.mrf.mxu1 }
 0x219   : > { %v740_v37 = vmul.f32 0.25, %v721_v36  ;;  %v745_v38 = vadd.f32 %v741_v35, %v635_v34 }
 0x21b   : > { %v752_v39 = vsel %vm748_vm4, %v745_v38, -inf  ;;  %v744_v40 = vadd.f32 %v740_v37, %v635_v34 }
 0x21c   : > { %v1542_v41 = vpop.f32.mrf.mxu1  ;;  %753 = vmax.xlane.f32.xlu1 %v752_v39 }
 0x21d   : > { %v749_v42 = vsel %vm748_vm4, %v744_v40, -inf  ;;  %v743_v44 = vmul.f32 0.25, %v1542_v41 }
 0x21e   : > { %v731_v43 = vpop.f32.mrf.mxu1  ;;  %750 = vmax.xlane.f32.xlu0 %v749_v42 }
 0x21f   : > { %v742_v45 = vmul.f32 0.25, %v731_v43  ;;  %v747_v48 = vadd.f32 %v743_v44, %v635_v34 }
 0x221   : > { %v746_v46 = vadd.f32 %v742_v45, %v635_v34  ;;  %v758_v49 = vsel %vm748_vm4, %v747_v48, -inf }
 0x223   : > { %v755_v47 = vsel %vm748_vm4, %v746_v46, -inf }
 0x224   : > { %756 = vmax.xlane.f32.xlu0 %v755_v47 }
 0x228   : > { %759 = vmax.xlane.f32.xlu0 %v758_v49 }
 0x289   : > { %v1555_v50 = vpop.f32.mrf.mxu1 }
 0x28a   : > { %v996_v51 = vmul.f32 0.25, %v1555_v50 }
 0x28b   : > { %v976_v52 = vpop.f32.mrf.mxu1 }
 0x28c   : > { %v995_v53 = vmul.f32 0.25, %v976_v52  ;;  %v1000_v54 = vadd.f32 %v996_v51, %v635_v34 }
 0x28e   : > { %v1558_v55 = vpop.f32.mrf.mxu1  ;;  %v1006_v56 = vsel %vm748_vm4, %v1000_v54, -inf  ;;  %v999_v57 = vadd.f32 %v995_v53, %v635_v34 }
 0x28f   : > { %v998_v58 = vmul.f32 0.25, %v1558_v55  ;;  %1007 = vmax.xlane.f32.xlu0 %v1006_v56 }
 0x290   : > { %v986_v59 = vpop.f32.mrf.mxu1  ;;  %v1003_v60 = vsel %vm748_vm4, %v999_v57, -inf }
 0x291   : > { %v997_v61 = vmul.f32 0.25, %v986_v59  ;;  %1004 = vmax.xlane.f32.xlu1 %v1003_v60  ;;  %v1002_v62 = vadd.f32 %v998_v58, %v635_v34 }
 0x293   : > { %v1012_v63 = vsel %vm748_vm4, %v1002_v62, -inf  ;;  %v1001_v0 = vadd.f32 %v997_v61, %v635_v34 }
 0x294   : > { %1013 = vmax.xlane.f32.xlu0 %v1012_v63 }
 0x295   : > { %v1009_v2 = vsel %vm748_vm4, %v1001_v0, -inf }
 0x296   : > { %1010 = vmax.xlane.f32.xlu1 %v1009_v2 }
 0x2a5   : > { %v754_v3 = vpop.xlane.xlu1 %753 }
 0x2a6   : > { %v762_v4 = vsub.f32 %v745_v38, %v754_v3 }
 0x2a7   : > { %v751_v6 = vpop.xlane.xlu0 %750 }
 0x2a8   : > { %v767_v7 = vmul.f32 1.442695, %v762_v4  ;;  %v761_v8 = vsub.f32 %v744_v40, %v751_v6 }
 0x2aa   : > { %1650 = vpow2.f32 %v767_v7  ;;  %v765_v9 = vmul.f32 1.442695, %v761_v8 }
 0x2ac   : > { %1652 = vpow2.f32 %v765_v9 }
 0x2ad   : > { %v757_v10 = vpop.xlane.xlu0 %756 }
 0x2ae   : > { %v763_v11 = vsub.f32 %v746_v46, %v757_v10 }
 0x2b0   : > { %v769_v12 = vmul.f32 1.442695, %v763_v11  ;;  %v1203_v11 = vld [vmem:[%s2116_s7 + $0x78] sm:$0xff] }
 0x2b1   : > { %v760_v13 = vpop.xlane.xlu0 %759  ;;  %1568 = vmatpush3.msra.mxu1 %v1203_v11 }
 0x2b2   : > { %1654 = vpow2.f32 %v769_v12  ;;  %v764_v14 = vsub.f32 %v747_v48, %v760_v13  ;;  %v1202_v12 = vld [vmem:[%s2116_s7 + $0x70] sm:$0xff]  ;;  %1569 = vmatprep.subr.mxu1 %v1750_v1 }
 0x2b3   : > { %1570 = vmatpush3.msra.mxu1 %v1202_v12 }
 0x2b4   : > { %v771_v15 = vmul.f32 1.442695, %v764_v14  ;;  %v1201_v14 = vld [vmem:[%s2116_s7 + $0x68] sm:$0xff]  ;;  %1571 = vmatprep.subr.mxu1 %v1750_v1 }
 0x2b5   : > { %1572 = vmatpush3.msra.mxu1 %v1201_v14 }
 0x2b6   : > { %1656 = vpow2.f32 %v771_v15  ;;  %v1200_v15 = vld [vmem:[%s2116_s7 + $0x60] sm:$0xff]  ;;  %1573 = vmatprep.subr.mxu1 %v1750_v1 }
 0x2b7   : > { %v1651_v16 = vpop.eup %1650  ;;  %1574 = vmatpush3.msra.mxu1 %v1200_v15 }
 0x2b8   : > { %v776_v17 = vsel %vm748_vm4, %v1651_v16, 0.0  ;;  %1575 = vmatprep.subr.mxu1 %v1750_v1 }
 0x2b9   : > { %v1653_v18 = vpop.eup %1652  ;;  %777 = vadd.xlane.f32.xlu0 %v776_v17  ;;  %v1198_v17 = vld [vmem:[%s2116_s7 + $0x50] sm:$0xff] }
 0x2ba   : > { %v773_v19 = vsel %vm748_vm4, %v1653_v18, 0.0 }
 0x2bb   : > { %774 = vadd.xlane.f32.xlu1 %v773_v19  ;;  %v1196_v19 = vld [vmem:[%s2116_s7 + $0x40] sm:$0xff] }
 0x2bf   : > { %v1655_v20 = vpop.eup %1654 }
 0x2c0   : > { %v779_v21 = vsel %vm748_vm4, %v1655_v20, 0.0 }
 0x2c1   : > { %780 = vadd.xlane.f32.xlu1 %v779_v21  ;;  %v1194_v21 = vld [vmem:[%s2116_s7 + $0x30] sm:$0xff] }
 0x2c3   : > { %v1657_v22 = vpop.eup %1656 }
 0x2c4   : > { %v782_v23 = vsel %vm748_vm4, %v1657_v22, 0.0 }
 0x2c5   : > { %783 = vadd.xlane.f32.xlu0 %v782_v23  ;;  %v1192_v23 = vld [vmem:[%s2116_s7 + $0x20] sm:$0xff] }
 0x318   : > { %v1008_v28 = vpop.xlane.xlu0 %1007 }
 0x319   : > { %v1016_v29 = vsub.f32 %v1000_v54, %v1008_v28  ;;  %v1189_v28 = vld [vmem:[%s2116_s7 + $0x8] sm:$0xff] }
 0x31a   : > { %v1005_v30 = vpop.xlane.xlu1 %1004 }
 0x31b   : > { %v1021_v31 = vmul.f32 1.442695, %v1016_v29  ;;  %v1015_v32 = vsub.f32 %v999_v57, %v1005_v30  ;;  %v1188_v30 = vld [vmem:[%s2116_s7] sm:$0xff] }
 0x31d   : > { %1658 = vpow2.f32 %v1021_v31  ;;  %v1019_v33 = vmul.f32 1.442695, %v1015_v32  ;;  %v1014_v34 = vpop.xlane.xlu0 %1013 }
 0x31e   : > { %v1018_v35 = vsub.f32 %v1002_v62, %v1014_v34 }
 0x31f   : > { %1660 = vpow2.f32 %v1019_v33  ;;  %v1011_v36 = vpop.xlane.xlu1 %1010 }
 0x320   : > { %v1025_v37 = vmul.f32 1.442695, %v1018_v35  ;;  %v1017_v38 = vsub.f32 %v1001_v0, %v1011_v36 }
 0x322   : > { %1662 = vpow2.f32 %v1025_v37  ;;  %v1023_v39 = vmul.f32 1.442695, %v1017_v38 }
 0x324   : > { %1664 = vpow2.f32 %v1023_v39 }
 0x32a   : > { %v1659_v40 = vpop.eup %1658 }
 0x32b   : > { %v1030_v41 = vsel %vm748_vm4, %v1659_v40, 0.0 }
 0x32c   : > { %v1661_v42 = vpop.eup %1660  ;;  %1031 = vadd.xlane.f32.xlu0 %v1030_v41 }
 0x32d   : > { %v1027_v43 = vsel %vm748_vm4, %v1661_v42, 0.0 }
 0x32e   : > { %1028 = vadd.xlane.f32.xlu1 %v1027_v43 }
 0x32f   : > { %v1663_v44 = vpop.eup %1662 }
 0x330   : > { %v1036_v45 = vsel %vm748_vm4, %v1663_v44, 0.0 }
 0x331   : > { %v1665_v46 = vpop.eup %1664  ;;  %1037 = vadd.xlane.f32.xlu0 %v1036_v45 }
 0x332   : > { %v1033_v47 = vsel %vm748_vm4, %v1665_v46, 0.0 }
 0x333   : > { %1034 = vadd.xlane.f32.xlu1 %v1033_v47 }
 0x342   : > { %v778_v48 = vpop.xlane.xlu0 %777 }
 0x343   : > { %1666 = vrcp.f32 %v778_v48  ;;  %v1443_v48 = vld [vmem:[%s2117_s8] ss:$0 sm:$0xff] }
 0x344   : > { %v775_v49 = vpop.xlane.xlu1 %774  ;;  %1048 = vrot.lane.b32.xlu1 %v627_v26, %s1755_s24 }
 0x345   : > { %1668 = vrcp.f32 %v775_v49 }
 0x34a   : > { %v781_v50 = vpop.xlane.xlu1 %780 }
 0x34b   : > { %1670 = vrcp.f32 %v781_v50 }
 0x34e   : > { %v784_v51 = vpop.xlane.xlu0 %783 }
 0x34f   : > { %1672 = vrcp.f32 %v784_v51 }
 0x350   : > { %v1667_v52 = vpop.eup %1666 }
 0x351   : > { %v790_v55 = vmul.f32 %v1667_v52, %v1651_v16  ;;  %v1199_v16 = vld [vmem:[%s2116_s7 + $0x58] sm:$0xff] }
 0x352   : > { %v1669_v53 = vpop.eup %1668  ;;  %1576 = vmatpush3.msra.mxu1 %v1199_v16 }
 0x353   : > { %v789_v54 = vmul.f32 %v1669_v53, %v1653_v18  ;;  %1577 = vmatprep.subr.mxu1 %v1750_v1  ;;  %v1197_v18 = vld [vmem:[%s2116_s7 + $0x48] sm:$0xff] }
 0x354   : > { %1578 = vmatpush3.msra.mxu1 %v1198_v17 }
 0x355   : > { %1545 = vmatprep.mubr.msk.f32.mxu0 %vm748_vm4, %v789_v54  ;;  %1579 = vmatprep.subr.mxu1 %v1750_v1 }
 0x356   : > { %1546 = vmatmul.mubr.msk.f32.vlgmr.msra.gmra.mxu0 %vm748_vm4, %v790_v55  ;;  %1580 = vmatpush3.msra.mxu1 %v1197_v18 }
 0x357   : > { %1581 = vmatprep.subr.mxu1 %v1750_v1 }
 0x358   : > { %v1671_v56 = vpop.eup %1670  ;;  %1582 = vmatpush3.msra.mxu1 %v1196_v19 }
 0x359   : > { %v791_v57 = vmul.f32 %v1671_v56, %v1655_v20  ;;  %v1195_v20 = vld [vmem:[%s2116_s7 + $0x38] sm:$0xff]  ;;  %1583 = vmatprep.subr.mxu1 %v1750_v1 }
 0x35a   : > { %1584 = vmatpush3.msra.mxu1 %v1195_v20 }
 0x35b   : > { %1548 = vmatprep.mubr.msk.f32.mxu0 %vm748_vm4, %v791_v57  ;;  %1585 = vmatprep.subr.mxu1 %v1750_v1 }
 0x35c   : > { %v1673_v58 = vpop.eup %1672  ;;  %1586 = vmatpush3.msra.mxu1 %v1194_v21 }
 0x35d   : > { %v792_v59 = vmul.f32 %v1673_v58, %v1657_v22  ;;  %1587 = vmatprep.subr.mxu1 %v1750_v1  ;;  %v1193_v22 = vld [vmem:[%s2116_s7 + $0x28] sm:$0xff] }
 0x35e   : > { %1588 = vmatpush3.msra.mxu1 %v1193_v22 }
 0x35f   : > { %1549 = vmatmul.mubr.msk.f32.gmra.mxu0 %vm748_vm4, %v792_v59  ;;  %1589 = vmatprep.subr.mxu1 %v1750_v1 }
 0x360   : > { %1590 = vmatpush3.msra.mxu1 %v1192_v23 }
 0x361   : > { %1591 = vmatprep.subr.mxu1 %v1750_v1 }
 0x362   : > { %1592 = vmatpush3.msra.mxu1 %v1191_v24 }
 0x363   : > { %1593 = vmatprep.subr.mxu1 %v1750_v1 }
 0x364   : > { %1594 = vmatpush3.msra.mxu1 %v1190_v27  ;;  %v1445_v27 = vld [vmem:[%s2119_s10] ss:$0 sm:$0xff] }
 0x365   : > { %1595 = vmatprep.subr.mxu1 %v1750_v1 }
 0x366   : > { %1596 = vmatpush3.msra.mxu1 %v1189_v28 }
 0x367   : > { %1597 = vmatprep.subr.mxu1 %v1750_v1 }
 0x368   : > { %1598 = vmatpush3.msra.mxu1 %v1188_v30 }
 0x3b5   : > { %v1032_v60 = vpop.xlane.xlu0 %1031 }
 0x3b6   : > { %1674 = vrcp.f32 %v1032_v60 }
 0x3b7   : > { %v1029_v61 = vpop.xlane.xlu1 %1028 }
 0x3b8   : > { %1676 = vrcp.f32 %v1029_v61 }
 0x3ba   : > { %v1038_v62 = vpop.xlane.xlu0 %1037 }
 0x3bb   : > { %1678 = vrcp.f32 %v1038_v62 }
 0x3bc   : > { %v1035_v63 = vpop.xlane.xlu1 %1034 }
 0x3bd   : > { %1680 = vrcp.f32 %v1035_v63 }
 0x3c0   : > { %v1049_v0 = vpop.permute.xlu1 %1048 }
 0x3c1   : > { %1559 = vmatprep.subr.mxu0 %v1049_v0 }
 0x3c2   : > { %1560 = vmatpush3.msra.mxu0 %v1049_v0 }
 0x3c3   : > { %v1675_v2 = vpop.eup %1674 }
 0x3c4   : > { %v1044_v6 = vmul.f32 %v1675_v2, %v1659_v40 }
 0x3c5   : > { %v1677_v3 = vpop.eup %1676 }
 0x3c6   : > { %v1043_v4 = vmul.f32 %v1677_v3, %v1661_v42 }
 0x3c8   : > { %1561 = vmatprep.mubr.msk.f32.mxu0 %vm748_vm4, %v1043_v4  ;;  %v1679_v7 = vpop.eup %1678 }
 0x3c9   : > { %1562 = vmatmul.mubr.msk.f32.vlgmr.msra.gmra.mxu0 %vm748_vm4, %v1044_v6  ;;  %v1046_v10 = vmul.f32 %v1679_v7, %v1663_v44 }
 0x3ca   : > { %v1681_v8 = vpop.eup %1680 }
 0x3cb   : > { %v1045_v9 = vmul.f32 %v1681_v8, %v1665_v46 }
 0x3cd   : > { %1564 = vmatprep.mubr.msk.f32.mxu0 %vm748_vm4, %v1045_v9 }
 0x3ce   : > { %1565 = vmatmul.mubr.msk.f32.gmra.mxu0 %vm748_vm4, %v1046_v10 }
 0x416   : > { %v1547_v13 = vpop.f32.mrf.mxu0 }
 0x417   : > { %1153 = vrot.lane.b32.xlu1 %v1547_v13, %s1752_s13 }
 0x418   : > { %v871_v25 = vpop.f32.mrf.mxu0 }
 0x41f   : > { %v1550_v26 = vpop.f32.mrf.mxu0 }
 0x421   : > { %v881_v29 = vpop.f32.mrf.mxu0 }
 0x489   : > { %v1563_v31 = vpop.f32.mrf.mxu0  ;;  %v1154_v1 = vpop.permute.xlu1 %1153 }
 0x48a   : > { %1157 = vrot.lane.b32.xlu1 %v1563_v31, %s1756_s16  ;;  %s1759_s16 = smov [#allocation2]  }
 0x48b   : > { %v1129_v32 = vpop.f32.mrf.mxu0 }
 0x48c   : > { %1149 = vrot.lane.b32.xlu0 %v1129_v32, %s1757_s15  ;;  %s1692_s15 = sshll.u32 %s1759_s16, 4  ;;  %s1693_s15 = int_to_ptr.vmem [resolvable:$false] %s1692_s15 }
 0x48e   : > { %v1566_v33 = vpop.f32.mrf.mxu0 }
 0x490   : > { %1161 = vrot.lane.b32.xlu0 %v881_v29, %s2131_s22  ;;  %v1139_v34 = vpop.f32.mrf.mxu0 }
 0x491   : > { %1165 = vrot.lane.b32.xlu1 %v1139_v34, %s1758_s25  ;;  %s1447_s25 = sshll.u32 %s1841_s21, 7  ;;  %s1694_s21 = scalar_lea.vmem %s1693_s15, 256 }
 0x492   : > { %s1352_s1 = scalar_lea.hbm %s2120_s11, %s1447_s25 }
 0x494   : > { %1169 = vrot.lane.b32.xlu0 %v1550_v26, %s2132_s29  ;;  %s377_s29 = scalar_lea.vmem [#allocation2], %s1417_s12 }
 0x495   : > { %1173 = vrot.lane.b32.xlu1 %v1566_v33, %s1755_s24  ;;  %s1354_s24 = sshll.u32 %s377_s29, 4  ;;  %s1355_s24 = int_to_ptr.vmem [resolvable:$true] %s1354_s24 }
 0x496   : > { %s1688_s14 = scalar_lea.vmem %s1355_s24, 128  ;;  %p1695_p0 = scmp.lt.s32.totalorder %s1355_s24, %s1693_s15 }
 0x497   : > { %p1689_p11 = scmp.ne.s32.totalorder %s1355_s24, %s1688_s14  ;;  %p1696_p1 = scmp.lt.s32.totalorder %s1694_s21, %s1688_s14 }
 0x499   : > { %p1690_p12 = pnand %p1689_p11, %p1858_p5  ;;  %p1697_p2 = por %p1696_p1, %p1695_p0 }
 0x49b   : > { %p1691_p13 = pneg %p1690_p12 }
 0x49d   : > { %p1698_p3 = pnand %p1697_p2, %p1691_p13 }
 0x4fc   : > { %v1158_v36 = vpop.permute.xlu1 %1157 }
 0x4fe   : > { %v1150_v35 = vpop.permute.xlu0 %1149 }
 0x4ff   : > { %v1176_v37 = vsel %vm643_vm2, %v871_v25, %v1150_v35 }
 0x500   : > { %v1177_v38 = vsel %vm394_vm1, %v1176_v37, %v1154_v1 }
 0x501   : > { %v1179_v39 = vsel %vm1178_vm5, %v1177_v38, %v1158_v36 }
 0x502   : > { %v1162_v40 = vpop.permute.xlu0 %1161 }
 0x503   : > { %v1181_v41 = vsel %vm1180_vm6, %v1179_v39, %v1162_v40  ;;  %v1166_v42 = vpop.permute.xlu1 %1165 }
 0x504   : > { %v1183_v43 = vsel %vm1182_vm7, %v1181_v41, %v1166_v42 }
 0x506   : > { %v1170_v44 = vpop.permute.xlu0 %1169 }
 0x507   : > { %v1185_v45 = vsel %vm1184_vm8, %v1183_v43, %v1170_v44  ;;  %v1174_v46 = vpop.permute.xlu1 %1173 }
 0x508   : > { %v1187_v47 = vsel %vm1186_vm9, %v1185_v45, %v1174_v46 }
 0x509   : > { %1600 = vmatmul.mubr.f32.vlgmr.msra.gmra.mxu1 %v1187_v47 }
 0x5c9   : > { %v1277_v49 = vpop.f32.mrf.mxu1 }
 0x5ca   : > { %v1278_v50 = vadd.f32 %v1443_v48, %v1277_v49 }
 0x5cb   : > { %v1601_v51 = vpop.f32.mrf.mxu1 }
 0x5cc   : > { %v1282_v52 = vmul.f32 0.70710677, %v1278_v50  ;;  %v1281_v12 = vmul.f32 0.5, %v1278_v50 }
 0x5ce   : > { %v1283_v53 = vand.u32 2147483647, %v1282_v52  ;;  %vm1303_vm10 = vcmp.ge.f32.partialorder %v1282_v52, 0.0 }
 0x5d0   : > { %v1284_v54 = vmul.f32 0.3275911, %v1283_v53  ;;  %v1297_v56 = vsub.f32 0.0, %v1283_v53 }
 0x5d2   : > { %v1285_v55 = vadd.f32 1.0, %v1284_v54  ;;  %v1298_v57 = vmul.f32 %v1297_v56, %v1283_v53 }
 0x5d4   : > { %1682 = vrcp.f32 %v1285_v55  ;;  %v1299_v59 = vmul.f32 1.442695, %v1298_v57 }
 0x5d6   : > { %1684 = vpow2.f32 %v1299_v59 }
 0x5e1   : > { %v1683_v58 = vpop.eup %1682 }
 0x5e2   : > { %v1288_v60 = vmul.f32 1.0614054, %v1683_v58 }
 0x5e3   : > { %v1685_v7 = vpop.eup %1684 }
 0x5e4   : > { %v1289_v61 = vadd.f32 -1.4531521, %v1288_v60 }
 0x5e6   : > { %v1290_v62 = vmul.f32 %v1683_v58, %v1289_v61 }
 0x5e8   : > { %v1291_v63 = vadd.f32 1.4214138, %v1290_v62 }
 0x5ea   : > { %v1292_v0 = vmul.f32 %v1683_v58, %v1291_v63 }
 0x5ec   : > { %v1293_v2 = vadd.f32 -0.28449672, %v1292_v0 }
 0x5ee   : > { %v1294_v3 = vmul.f32 %v1683_v58, %v1293_v2 }
 0x5f0   : > { %v1295_v4 = vadd.f32 0.2548296, %v1294_v3 }
 0x5f2   : > { %v1296_v6 = vmul.f32 %v1683_v58, %v1295_v4 }
 0x5f4   : > { %v1301_v8 = vmul.f32 %v1685_v7, %v1296_v6 }
 0x5f6   : > { %v1302_v9 = vsub.f32 1.0, %v1301_v8 }
 0x5f8   : > { %v1304_v10 = vsub.f32 0.0, %v1302_v9 }
 0x5fa   : > { %v1305_v11 = vsel %vm1303_vm10, %v1302_v9, %v1304_v10 }
 0x5fb   : > { %v1306_v13 = vadd.f32 1.0, %v1305_v11 }
 0x5fd   : > { %v1307_v14 = vmul.f32 %v1306_v13, %v1281_v12 }
 0x5ff   : > { %v1308_v15 = vadd.f32 %v1307_v14, %v1890_v5  ;;  %v1444_v5 = vld [vmem:[%s2118_s9] ss:$0 sm:$0xff] }
 0x601   : > { %v1309_v16 = vsel %vm394_vm1, %v1308_v15, 0.0 }
 0x602   : > { %1310 = vadd.xlane.f32.xlu0 %v1309_v16 }
 0x68b   : > { %v1311_v17 = vpop.xlane.xlu0 %1310 }
 0x68c   : > { %v1313_v18 = vmul.f32 0.03125, %v1311_v17 }
 0x68e   : > { %v1314_v19 = vsub.f32 %v1308_v15, %v1313_v18 }
 0x690   : > { %v1315_v20 = vmul.f32 %v1314_v19, %v1314_v19 }
 0x692   : > { %v1316_v21 = vsel %vm394_vm1, %v1315_v20, 0.0 }
 0x693   : > { %1317 = vadd.xlane.f32.xlu1 %v1316_v21 }
 0x71c   : > { %v1318_v22 = vpop.xlane.xlu1 %1317 }
 0x71d   : > { %v1319_v23 = vmul.f32 0.03125, %v1318_v22 }
 0x71f   : > { %v1320_v24 = vadd.f32 1e-05, %v1319_v23 }
 0x721   : > { %1686 = vrsqrt.f32 %v1320_v24 }
 0x72e   : > { %v1687_v25 = vpop.eup %1686 }
 0x72f   : > { %v1322_v26 = vmul.f32 %v1687_v25, %v1314_v19 }
 0x731   : > { %v1330_v28 = vmul.f32 %v1444_v5, %v1322_v26 }
 0x733   : > { %v1338_v29 = vadd.f32 %v1445_v27, %v1330_v28 }
 0x735   : > { %1339 = vst.msk [vmem:[%s377_s29] sm:$0xff] %vm394_vm1, %v1338_v29 }
 0x736   : > { %1701 = shalt.err (!%p1698_p3)
}
 0x737   : > { %s1702_s0 = scalar_lea.hbm %s1352_s1, 128  ;;  %s1706_s22 = scalar_lea.hbm %s2120_s11, 256 }
 0x738   : > { %p1703_p4 = scmp.ne.s32.totalorder %s1352_s1, %s1702_s0  ;;  %p1707_p9 = scmp.lt.s32.totalorder %s1352_s1, %s2120_s11 }
 0x739   : > { %p1708_p10 = scmp.lt.s32.totalorder %s1706_s22, %s1702_s0 }
 0x73a   : > { %p1704_p7 = pnand %p1703_p4, %p1858_p5 }
 0x73b   : > { %p1709_p11 = por %p1708_p10, %p1707_p9 }
 0x73c   : > { %p1705_p8 = pneg %p1704_p7 }
 0x73e   : > { %p1710_p12 = pnand %p1709_p11, %p1705_p8 }
 0x740   : > { %1713 = shalt.err (!%p1710_p12)
}
 0x741   : > { %1602 = dma.vmem_to_hbm [thread:$0]  (%p1858_p5), %s1355_s24, 128, %s1352_s1, %s1341_s2  }
 0x742 PF: > { %p1608_p13 = scmp.ge.s32.totalorder %s1748_s20, 2  ;;  %s1366_s13 = sand.u32 1, %s1736_s17  }
 0x743   : > { %s1367_s14 = scalar_lea.sflag [#allocation3], %s1366_s13 }
 0x744   : > { %p1605_p0 = pnand %p1608_p13, %p1862_p6 }
 0x746   : > { %p1606_p1 = pneg %p1605_p0 }
 0x748   : > { %1731 = dma.done.wait (%p1606_p1), %s1367_s14, 128  }
 0x749   : > { %1733 = vsyncadd (%p1606_p1), %s1367_s14, 4294967168  ;;  %p21_p2 = scmp.ge.s32.totalorder %s1845_s23, 4   ;;  %s2133_s17 = smov %s1740_s18 }
 0x74a   : > { %s2134_s18 = smov %s1744_s19  ;;  %s2135_s19 = smov %s1856_s26 }
 0x74b   : > { %s2136_s20 = smov %s1845_s23  ;;  %23 = sbr.rel (!%p21_p2) target bundleno = 7 (0x7), region = 99 }
 0x750   :  { %1372 = vsyncpa [#allocation3], 1 }
 0x751   :  { %1374 = vsyncpa [#allocation3 + $0x1], 1 }

</bundles_post_ra>
